<compile_context>
chip_gen: v7x
topology: tpu7x:2x2x1
jax: 0.10.0
libtpu: 0.0.40
codegen_flags: <defaults>
</compile_context>

<pallas_src>
import jax
import jax.numpy as jnp
import numpy as np
from jax import lax
from jax.experimental import pallas as pl
from jax.experimental.pallas import tpu as pltpu


def _basis_rotation_kernel(x_ref, w_ref, o_ref):
    # x_ref: (TB, Cin*D*D)        batch tile of vectorized inputs
    # w_ref: (Cin*D*D, TI*D*D)    Kron weight block for a tile of output chans
    # o_ref: (TB, TI*D*D)         vectorized output tile (lane-dense)
    o_ref[...] = jnp.dot(
        x_ref[...], w_ref[...], preferred_element_type=jnp.float32
    )


def _round_up(x: int, m: int) -> int:
    return ((x + m - 1) // m) * m


def basis_rotation(x, R):
    """x: (B, Cin, D, D) f32, R: (Cout, Cin, D, D) f32 -> (B, Cout, D, D) f32."""
    x = jnp.asarray(x, jnp.float32)
    R = jnp.asarray(R, jnp.float32)
    B, Cin, D, _ = x.shape
    Cout = R.shape[0]
    d2 = D * D
    K = Cin * d2

    # --- Kronecker weight:  W[(j,c,d),(i,a,b)] = R[i,j,a,c] * R[i,j,b,d] ----
    # out[n,i,a,b] = sum_{j,c,d} x[n,j,c,d] * R[i,j,a,c] * R[i,j,b,d]
    W6 = jnp.einsum("ijac,ijbd->jcdiab", R, R)       # (Cin, D, D, Cout, D, D)

    # Cout tile: keep all of Cout in one block unless the weight block would
    # exceed ~4 MiB; only split when the split block stays 128-lane aligned.
    ti = Cout
    if d2 % 128 == 0:
        max_ti = max(1, (4 * 1024 * 1024) // (K * d2 * 4))
        ti = min(Cout, max_ti)
    Cout_p = _round_up(Cout, ti)
    n_ci = Cout_p // ti
    if Cout_p != Cout:
        W6 = jnp.pad(
            W6, ((0, 0), (0, 0), (0, 0), (0, Cout_p - Cout), (0, 0), (0, 0))
        )
    W = W6.reshape(K, Cout_p * d2)

    # --- batch tile (sublane dim): multiple of 8, capped ---------------------
    tb = min(_round_up(B, 8), 128)
    Bp = _round_up(B, tb)
    nb = Bp // tb
    xf = x.reshape(B, K)                             # contiguous -> free
    if Bp != B:
        xf = jnp.pad(xf, ((0, Bp - B), (0, 0)))

    out = pl.pallas_call(
        _basis_rotation_kernel,
        out_shape=jax.ShapeDtypeStruct((Bp, Cout_p * d2), jnp.float32),
        grid_spec=pltpu.PrefetchScalarGridSpec(
            num_scalar_prefetch=0,
            grid=(nb, n_ci),
            in_specs=[
                # x tile: constant across the inner Cout-tile axis -> resident.
                pl.BlockSpec((tb, K), lambda bt, ci: (bt, 0)),
                # Kron weight block for this tile of output channels.
                pl.BlockSpec((K, ti * d2), lambda bt, ci: (0, ci)),
            ],
            out_specs=pl.BlockSpec((tb, ti * d2), lambda bt, ci: (bt, ci)),
        ),
        compiler_params=pltpu.CompilerParams(
            dimension_semantics=("parallel", "parallel"),
            vmem_limit_bytes=32 * 1024 * 1024,
        ),
    )(xf, W)

    out = out.reshape(Bp, Cout_p, D, D)              # contiguous -> free
    return out[:B, :Cout]


def make_basis_rotation_params(input_shape, output_channels):
    """Deterministic init matching BasisRotation.__init__: identity per (i, j)."""
    input_channels = input_shape[0]
    mat_dim = input_shape[-1]
    R = np.zeros(
        [output_channels, input_channels, mat_dim, mat_dim], dtype=np.float32
    )
    for i in range(output_channels):
        for j in range(input_channels):
            for k in range(mat_dim):
                R[i][j][k][k] = 1.0
    return jnp.asarray(R)


def basis_rotation_ref(x, R):
    # plain-JAX reference: out[n,i,a,d] = sum_j (R[i,j] @ x[n,j] @ R[i,j]^T)[a,d]
    return jnp.einsum(
        "ijab,njbc,ijdc->niad", R, x, R, precision=lax.Precision.HIGHEST
    )


if __name__ == "__main__":
    B, Cin, Cout, D = 2, 4, 3, 16
    key = jax.random.PRNGKey(0)
    kx, kr = jax.random.split(key)

    x = jax.random.normal(kx, (B, Cin, D, D), dtype=jnp.float32)

    # 1) module-default parameter (identity stacks, as in BasisRotation.__init__)
    R_init = make_basis_rotation_params((Cin, D, D), Cout)
    out0 = jax.block_until_ready(basis_rotation(x, R_init))
    np.testing.assert_allclose(
        np.asarray(out0), np.asarray(basis_rotation_ref(x, R_init)),
        rtol=1e-5, atol=1e-5)

    # 2) random operator (exercises the full sandwich-product math / layouts)
    R_rand = jax.random.normal(kr, (Cout, Cin, D, D), dtype=jnp.float32)
    out1 = jax.block_until_ready(basis_rotation(x, R_rand))
    np.testing.assert_allclose(
        np.asarray(out1), np.asarray(basis_rotation_ref(x, R_rand)),
        rtol=1e-4, atol=1e-4)

    print("KERNEL_OK")
</pallas_src>

<mosaic_0001>
module attributes {stable_mosaic.version = 11 : i64} {
  func.func @_basis_rotation_kernel(%arg0: i32, %arg1: i32, %arg2: memref<8x1024xf32, #tpu.memory_space<vmem>>, %arg3: memref<1024x768xf32, #tpu.memory_space<vmem>>, %arg4: memref<8x768xf32, #tpu.memory_space<vmem>>) attributes {dimension_semantics = [#tpu.dimension_semantics<parallel>, #tpu.dimension_semantics<parallel>], iteration_bounds = array<i64: 1, 1>, scalar_prefetch = 0 : i64, scratch_operands = 0 : i64, tpu.core_type = #tpu.core_type<tc>, window_params = [{transform_indices = @transform_0, window_bounds = array<i64: 8, 1024>}, {transform_indices = @transform_1, window_bounds = array<i64: 1024, 768>}, {transform_indices = @transform_2, window_bounds = array<i64: 8, 768>}]} {
    %c0 = arith.constant 0 : index
    %c0_0 = arith.constant 0 : index
    %0 = vector.load %arg2[%c0, %c0_0] : memref<8x1024xf32, #tpu.memory_space<vmem>>, vector<8x1024xf32>
    %c0_1 = arith.constant 0 : index
    %c0_2 = arith.constant 0 : index
    %1 = vector.load %arg3[%c0_1, %c0_2] : memref<1024x768xf32, #tpu.memory_space<vmem>>, vector<1024x768xf32>
    %cst = arith.constant dense<0.000000e+00> : vector<8x768xf32>
    %2 = tpu.matmul %0, %1, %cst {dimension_numbers = #tpu.dot_dimension_numbers<[1], [0], [0], [1], [0, 0, 1, 1], [], []>} : vector<8x1024xf32>, vector<1024x768xf32>, vector<8x768xf32> -> vector<8x768xf32>
    %c0_3 = arith.constant 0 : index
    %c0_4 = arith.constant 0 : index
    %3 = vector.load %arg4[%c0_3, %c0_4] : memref<8x768xf32, #tpu.memory_space<vmem>>, vector<8x768xf32>
    tpu.vector_store %arg4[%c0_3, %c0_4], %2 {strides = array<i32>} : memref<8x768xf32, #tpu.memory_space<vmem>>, vector<8x768xf32>,
    return
  }
  func.func @transform_0(%arg0: i32, %arg1: i32) -> (i32, i32) {
    %c0_i32 = arith.constant 0 : i32
    %c0_i32_0 = arith.constant 0 : i32
    return %arg0, %c0_i32 : i32, i32
  }
  func.func @transform_1(%arg0: i32, %arg1: i32) -> (i32, i32) {
    %c0_i32 = arith.constant 0 : i32
    %c0_i32_0 = arith.constant 0 : i32
    return %c0_i32, %arg1 : i32, i32
  }
  func.func @transform_2(%arg0: i32, %arg1: i32) -> (i32, i32) {
    %c0_i32 = arith.constant 0 : i32
    return %arg0, %arg1 : i32, i32
  }
}

</mosaic_0001>

<bundles_post_ra>
// kernel: tpu_custom_call.1
= control target key start
LH: loop header
LB: loop body
LE: loop exit
PB: predicated region body
PF: predicated region fallthrough
CT: control target
= control target key end

     0   :  { %7 = vsyncpa [#allocation3], 0  ;;  %s2630_s0 = inlined_call_operand.hbm [shape: f32[8,1024], index: 0, kind: input, shape index: {}]   ;;  %s2631_s1 = inlined_call_operand.hbm [shape: f32[1024,768], index: 1, kind: input, shape index: {}]   ;;  %s2632_s2 = inlined_call_operand.hbm [shape: f32[8,768], index: 2, kind: output, shape index: {}]  }
   0x1   :  { %8 = vsyncpa [#allocation6], 0 }
   0x2   :  { %9 = vsyncpa [#allocation4], 0  ;;  %s2557_s9 = smov [#allocation2]   ;;  %s2558_s11 = smov [#allocation5]  }
   0x3   :  { %s16_s10 = sshll.u32 %s2557_s9, 4  ;;  %s25_s12 = sshll.u32 %s2558_s11, 4  ;;  %s17_s10 = int_to_ptr.vmem [resolvable:$true] %s16_s10  ;;  %s2577_s12 = int_to_ptr.vmem [resolvable:$true] %s25_s12 }
   0x4   :  { %s2485_s15 = scalar_lea.hbm %s2630_s0, 1024 }
   0x5   :  { %p2486_p0 = scmp.ne.s32.totalorder %s2630_s0, %s2485_s15  ;;  %p2489_p1 = scmp.lt.u32.totalorder %s2485_s15, %s2630_s0 }
   0x7   :  { %p2491_p2 = pnand %p2489_p1, %p2486_p0 }
   0x9   :  { %2494 = shalt.err (!%p2491_p2)
}
   0xa   :  { %s2495_s20 = scalar_lea.vmem %s17_s10, 1024  ;;  %p2500_p4 = scmp.lt.s32.totalorder %s17_s10, %s17_s10 }
   0xb   :  { %p2496_p3 = scmp.ne.s32.totalorder %s17_s10, %s2495_s20  ;;  %p2501_p5 = scmp.lt.s32.totalorder %s2495_s20, %s2495_s20 }
   0xd   :  { %p2502_p6 = por %p2501_p5, %p2500_p4 }
   0xf   :  { %p2503_p7 = pnand %p2502_p6, %p2496_p3 }
  0x11   :  { %2506 = shalt.err (!%p2503_p7)
}
  0x12   :  { %19 = dma.hbm_to_vmem [thread:$0]  %s2630_s0, 1024, %s17_s10, [#allocation3]  }
  0x13   :  { %s2507_s25 = scalar_lea.hbm %s2631_s1, 98304 }
  0x14   :  { %p2508_p8 = scmp.ne.s32.totalorder %s2631_s1, %s2507_s25  ;;  %p2511_p9 = scmp.lt.u32.totalorder %s2507_s25, %s2631_s1 }
  0x16   :  { %p2513_p10 = pnand %p2511_p9, %p2508_p8 }
  0x18   :  { %2516 = shalt.err (!%p2513_p10)
}
  0x19   :  { %s2517_s30 = scalar_lea.vmem %s2577_s12, 98304  ;;  %p2522_p12 = scmp.lt.s32.totalorder %s2577_s12, %s2577_s12 }
  0x1a   :  { %p2518_p11 = scmp.ne.s32.totalorder %s2577_s12, %s2517_s30  ;;  %p2523_p13 = scmp.lt.s32.totalorder %s2517_s30, %s2517_s30 }
  0x1c   :  { %p2524_p0 = por %p2523_p13, %p2522_p12 }
  0x1e   :  { %p2525_p1 = pnand %p2524_p0, %p2518_p11 }
  0x20   :  { %2528 = shalt.err (!%p2525_p1)
}
  0x21   :  { %s2559_s0 = smov 768   ;;  %s2560_s3 = smov 48  }
  0x22   :  { %31 = dma.hbm_to_vmem [thread:$0]  %s2631_s1, 98304, %s2577_s12, [#allocation6], %s2559_s0, %s2559_s0, %s2560_s3  }
  0x23   :  { %2551 = dma.done.wait [#allocation3], 1024  }
  0x24   :  { %2552 = vsyncadd [#allocation3], 4294966272 }
  0x25   :  { %2553 = dma.done.wait [#allocation6], 98304  }
  0x26   :  { %2554 = vsyncadd [#allocation6], 4294868992  ;;  %v47_v0 = vld [vmem:[#allocation5 + $0x8] sm:$0xff]  ;;  %v53_v1 = vld [vmem:[#allocation5 + $0x38] sm:$0xff]  ;;  %s2561_s1 = smov [#allocation7]  }
  0x27   :  { %v431_v2 = vld [vmem:[#allocation5 + $0xc08] sm:$0xff]  ;;  %v1688_v3 = vpack.c.bf16 %v53_v1, %v47_v0  ;;  %v437_v4 = vld [vmem:[#allocation5 + $0xc38] sm:$0xff]  ;;  %v46_v5 = vld [vmem:[#allocation5] sm:$0xff]  ;;  %s1678_s6 = sshll.u32 %s2561_s1, 4  ;;  %s1679_s6 = int_to_ptr.vmem [resolvable:$true] %s1678_s6 }
  0x28   :  { %v52_v6 = vld [vmem:[#allocation5 + $0x30] sm:$0xff]  ;;  %v1816_v7 = vpack.c.bf16 %v437_v4, %v431_v2  ;;  %v430_v9 = vld [vmem:[#allocation5 + $0xc00] sm:$0xff]  ;;  %v59_v11 = vld [vmem:[#allocation5 + $0x68] sm:$0xff]  ;;  %s2529_s7 = scalar_lea.vmem %s1679_s6, 768  ;;  %p2534_p3 = scmp.lt.s32.totalorder %s1679_s6, %s1679_s6 }
  0x29   :  { %v1690_v8 = vpack.c.bf16 %v52_v6, %v46_v5  ;;  %v436_v10 = vld [vmem:[#allocation5 + $0xc30] sm:$0xff]  ;;  %1689 = vmatprep.subr.bf16.mxu1 %v1688_v3  ;;  %v65_v13 = vld [vmem:[#allocation5 + $0x98] sm:$0xff]  ;;  %v443_v14 = vld [vmem:[#allocation5 + $0xc68] sm:$0xff]  ;;  %p2530_p2 = scmp.ne.s32.totalorder %s1679_s6, %s2529_s7  ;;  %p2535_p4 = scmp.lt.s32.totalorder %s2529_s7, %s2529_s7 }
  0x2a   :  { %v1818_v12 = vpack.c.bf16 %v436_v10, %v430_v9  ;;  %v449_v15 = vld [vmem:[#allocation5 + $0xc98] sm:$0xff]  ;;  %1817 = vmatprep.subr.bf16.mxu0 %v1816_v7  ;;  %v1692_v16 = vpack.c.bf16 %v65_v13, %v59_v11  ;;  %v58_v18 = vld [vmem:[#allocation5 + $0x60] sm:$0xff]  ;;  %v64_v19 = vld [vmem:[#allocation5 + $0x90] sm:$0xff] }
  0x2b   :  { %1691 = vmatpush1.bf16.msra.mxu1 %v1690_v8  ;;  %v1820_v17 = vpack.c.bf16 %v449_v15, %v443_v14  ;;  %v442_v20 = vld [vmem:[#allocation5 + $0xc60] sm:$0xff]  ;;  %v1694_v21 = vpack.c.bf16 %v64_v19, %v58_v18  ;;  %v448_v22 = vld [vmem:[#allocation5 + $0xc90] sm:$0xff]  ;;  %v71_v23 = vld [vmem:[#allocation5 + $0xc8] sm:$0xff]  ;;  %p2536_p5 = por %p2535_p4, %p2534_p3 }
  0x2c   :  { %1819 = vmatpush1.bf16.msra.mxu0 %v1818_v12  ;;  %v77_v24 = vld [vmem:[#allocation5 + $0xf8] sm:$0xff]  ;;  %1693 = vmatprep.subr.bf16.mxu1 %v1692_v16  ;;  %v1822_v25 = vpack.c.bf16 %v448_v22, %v442_v20  ;;  %v455_v27 = vld [vmem:[#allocation5 + $0xcc8] sm:$0xff]  ;;  %v70_v29 = vld [vmem:[#allocation5 + $0xc0] sm:$0xff] }
  0x2d   :  { %1821 = vmatprep.subr.bf16.mxu0 %v1820_v17  ;;  %v1696_v26 = vpack.c.bf16 %v77_v24, %v71_v23  ;;  %v461_v28 = vld [vmem:[#allocation5 + $0xcf8] sm:$0xff]  ;;  %v76_v31 = vld [vmem:[#allocation5 + $0xf0] sm:$0xff]  ;;  %v454_v32 = vld [vmem:[#allocation5 + $0xcc0] sm:$0xff]  ;;  %p2537_p6 = pnand %p2536_p5, %p2530_p2 }
  0x2e   :  { %v1824_v30 = vpack.c.bf16 %v461_v28, %v455_v27  ;;  %v460_v33 = vld [vmem:[#allocation5 + $0xcf0] sm:$0xff]  ;;  %v1698_v34 = vpack.c.bf16 %v76_v31, %v70_v29  ;;  %v83_v35 = vld [vmem:[#allocation5 + $0x128] sm:$0xff]  ;;  %v89_v36 = vld [vmem:[#allocation5 + $0x158] sm:$0xff] }
  0x2f   :  { %1695 = vmatpush1.bf16.msra.mxu1 %v1694_v21  ;;  %v467_v37 = vld [vmem:[#allocation5 + $0xd28] sm:$0xff]  ;;  %v1826_v38 = vpack.c.bf16 %v460_v33, %v454_v32  ;;  %v1700_v39 = vpack.c.bf16 %v89_v36, %v83_v35  ;;  %v473_v40 = vld [vmem:[#allocation5 + $0xd58] sm:$0xff]  ;;  %v82_v41 = vld [vmem:[#allocation5 + $0x120] sm:$0xff] }
  0x30   :  { %1823 = vmatpush1.bf16.msra.mxu0 %v1822_v25  ;;  %1697 = vmatprep.subr.bf16.mxu1 %v1696_v26  ;;  %v88_v42 = vld [vmem:[#allocation5 + $0x150] sm:$0xff]  ;;  %v1828_v43 = vpack.c.bf16 %v473_v40, %v467_v37  ;;  %v466_v44 = vld [vmem:[#allocation5 + $0xd20] sm:$0xff]  ;;  %v95_v46 = vld [vmem:[#allocation5 + $0x188] sm:$0xff] }
  0x31   :  { %1825 = vmatprep.subr.bf16.mxu0 %v1824_v30  ;;  %v472_v45 = vld [vmem:[#allocation5 + $0xd50] sm:$0xff]  ;;  %v101_v47 = vld [vmem:[#allocation5 + $0x1b8] sm:$0xff]  ;;  %v479_v48 = vld [vmem:[#allocation5 + $0xd88] sm:$0xff]  ;;  %v1702_v50 = vpack.c.bf16 %v88_v42, %v82_v41 }
  0x32   :  { %v485_v49 = vld [vmem:[#allocation5 + $0xdb8] sm:$0xff]  ;;  %v1830_v51 = vpack.c.bf16 %v472_v45, %v466_v44  ;;  %v1704_v52 = vpack.c.bf16 %v101_v47, %v95_v46  ;;  %v94_v53 = vld [vmem:[#allocation5 + $0x180] sm:$0xff]  ;;  %v100_v54 = vld [vmem:[#allocation5 + $0x1b0] sm:$0xff] }
  0x33   :  { %1699 = vmatpush1.bf16.msra.mxu1 %v1698_v34  ;;  %v478_v55 = vld [vmem:[#allocation5 + $0xd80] sm:$0xff]  ;;  %v1832_v56 = vpack.c.bf16 %v485_v49, %v479_v48  ;;  %v484_v57 = vld [vmem:[#allocation5 + $0xdb0] sm:$0xff]  ;;  %v107_v58 = vld [vmem:[#allocation5 + $0x1e8] sm:$0xff]  ;;  %v1706_v62 = vpack.c.bf16 %v100_v54, %v94_v53 }
  0x34   :  { %1827 = vmatpush1.bf16.msra.mxu0 %v1826_v38  ;;  %1701 = vmatprep.subr.bf16.mxu1 %v1700_v39  ;;  %v113_v59 = vld [vmem:[#allocation5 + $0x218] sm:$0xff]  ;;  %v491_v60 = vld [vmem:[#allocation5 + $0xde8] sm:$0xff]  ;;  %v1834_v63 = vpack.c.bf16 %v484_v57, %v478_v55  ;;  %v106_v1 = vld [vmem:[#allocation5 + $0x1e0] sm:$0xff] }
  0x35   :  { %1829 = vmatprep.subr.bf16.mxu0 %v1828_v43  ;;  %v497_v61 = vld [vmem:[#allocation5 + $0xe18] sm:$0xff]  ;;  %v1708_v0 = vpack.c.bf16 %v113_v59, %v107_v58  ;;  %v112_v2 = vld [vmem:[#allocation5 + $0x210] sm:$0xff]  ;;  %v490_v3 = vld [vmem:[#allocation5 + $0xde0] sm:$0xff] }
  0x36   :  { %v1836_v4 = vpack.c.bf16 %v497_v61, %v491_v60  ;;  %v496_v5 = vld [vmem:[#allocation5 + $0xe10] sm:$0xff]  ;;  %v119_v6 = vld [vmem:[#allocation5 + $0x248] sm:$0xff]  ;;  %v125_v7 = vld [vmem:[#allocation5 + $0x278] sm:$0xff]  ;;  %v1710_v10 = vpack.c.bf16 %v112_v2, %v106_v1 }
  0x37   :  { %1703 = vmatpush1.bf16.msra.mxu1 %v1702_v50  ;;  %v503_v8 = vld [vmem:[#allocation5 + $0xe48] sm:$0xff]  ;;  %v509_v9 = vld [vmem:[#allocation5 + $0xe78] sm:$0xff]  ;;  %v1838_v11 = vpack.c.bf16 %v496_v5, %v490_v3  ;;  %v1712_v12 = vpack.c.bf16 %v125_v7, %v119_v6  ;;  %v118_v13 = vld [vmem:[#allocation5 + $0x240] sm:$0xff] }
  0x38   :  { %1831 = vmatpush1.bf16.msra.mxu0 %v1830_v51  ;;  %1705 = vmatprep.subr.bf16.mxu1 %v1704_v52  ;;  %v124_v14 = vld [vmem:[#allocation5 + $0x270] sm:$0xff]  ;;  %v502_v15 = vld [vmem:[#allocation5 + $0xe40] sm:$0xff]  ;;  %v1840_v16 = vpack.c.bf16 %v509_v9, %v503_v8  ;;  %v131_v18 = vld [vmem:[#allocation5 + $0x2a8] sm:$0xff] }
  0x39   :  { %1833 = vmatprep.subr.bf16.mxu0 %v1832_v56  ;;  %v508_v17 = vld [vmem:[#allocation5 + $0xe70] sm:$0xff]  ;;  %v137_v19 = vld [vmem:[#allocation5 + $0x2d8] sm:$0xff]  ;;  %v515_v20 = vld [vmem:[#allocation5 + $0xea8] sm:$0xff]  ;;  %v1714_v22 = vpack.c.bf16 %v124_v14, %v118_v13 }
  0x3a   :  { %v521_v21 = vld [vmem:[#allocation5 + $0xed8] sm:$0xff]  ;;  %v1842_v23 = vpack.c.bf16 %v508_v17, %v502_v15  ;;  %v1716_v24 = vpack.c.bf16 %v137_v19, %v131_v18  ;;  %v130_v25 = vld [vmem:[#allocation5 + $0x2a0] sm:$0xff]  ;;  %v136_v26 = vld [vmem:[#allocation5 + $0x2d0] sm:$0xff] }
  0x3b   :  { %1707 = vmatpush1.bf16.msra.mxu1 %v1706_v62  ;;  %v514_v27 = vld [vmem:[#allocation5 + $0xea0] sm:$0xff]  ;;  %v1844_v28 = vpack.c.bf16 %v521_v21, %v515_v20  ;;  %v520_v29 = vld [vmem:[#allocation5 + $0xed0] sm:$0xff]  ;;  %v143_v30 = vld [vmem:[#allocation5 + $0x308] sm:$0xff]  ;;  %v1718_v34 = vpack.c.bf16 %v136_v26, %v130_v25 }
  0x3c   :  { %1835 = vmatpush1.bf16.msra.mxu0 %v1834_v63  ;;  %1709 = vmatprep.subr.bf16.mxu1 %v1708_v0  ;;  %v149_v31 = vld [vmem:[#allocation5 + $0x338] sm:$0xff]  ;;  %v527_v32 = vld [vmem:[#allocation5 + $0xf08] sm:$0xff]  ;;  %v1846_v35 = vpack.c.bf16 %v520_v29, %v514_v27  ;;  %v142_v37 = vld [vmem:[#allocation5 + $0x300] sm:$0xff] }
  0x3d   :  { %1837 = vmatprep.subr.bf16.mxu0 %v1836_v4  ;;  %v533_v33 = vld [vmem:[#allocation5 + $0xf38] sm:$0xff]  ;;  %v1720_v36 = vpack.c.bf16 %v149_v31, %v143_v30  ;;  %v148_v38 = vld [vmem:[#allocation5 + $0x330] sm:$0xff]  ;;  %v526_v39 = vld [vmem:[#allocation5 + $0xf00] sm:$0xff] }
  0x3e   :  { %v1848_v40 = vpack.c.bf16 %v533_v33, %v527_v32  ;;  %v532_v41 = vld [vmem:[#allocation5 + $0xf30] sm:$0xff]  ;;  %v155_v42 = vld [vmem:[#allocation5 + $0x368] sm:$0xff]  ;;  %v161_v43 = vld [vmem:[#allocation5 + $0x398] sm:$0xff]  ;;  %v1722_v46 = vpack.c.bf16 %v148_v38, %v142_v37 }
  0x3f   :  { %1711 = vmatpush1.bf16.msra.mxu1 %v1710_v10  ;;  %v539_v44 = vld [vmem:[#allocation5 + $0xf68] sm:$0xff]  ;;  %v545_v45 = vld [vmem:[#allocation5 + $0xf98] sm:$0xff]  ;;  %v1850_v47 = vpack.c.bf16 %v532_v41, %v526_v39  ;;  %v1724_v48 = vpack.c.bf16 %v161_v43, %v155_v42  ;;  %v154_v49 = vld [vmem:[#allocation5 + $0x360] sm:$0xff] }
  0x40   :  { %1839 = vmatpush1.bf16.msra.mxu0 %v1838_v11  ;;  %1713 = vmatprep.subr.bf16.mxu1 %v1712_v12  ;;  %v160_v50 = vld [vmem:[#allocation5 + $0x390] sm:$0xff]  ;;  %v538_v51 = vld [vmem:[#allocation5 + $0xf60] sm:$0xff]  ;;  %v1852_v52 = vpack.c.bf16 %v545_v45, %v539_v44  ;;  %v167_v54 = vld [vmem:[#allocation5 + $0x3c8] sm:$0xff] }
  0x41   :  { %1841 = vmatprep.subr.bf16.mxu0 %v1840_v16  ;;  %v544_v53 = vld [vmem:[#allocation5 + $0xf90] sm:$0xff]  ;;  %v173_v55 = vld [vmem:[#allocation5 + $0x3f8] sm:$0xff]  ;;  %v551_v56 = vld [vmem:[#allocation5 + $0xfc8] sm:$0xff]  ;;  %v1726_v58 = vpack.c.bf16 %v160_v50, %v154_v49 }
  0x42   :  { %v557_v57 = vld [vmem:[#allocation5 + $0xff8] sm:$0xff]  ;;  %v1854_v59 = vpack.c.bf16 %v544_v53, %v538_v51  ;;  %v1728_v60 = vpack.c.bf16 %v173_v55, %v167_v54  ;;  %v166_v61 = vld [vmem:[#allocation5 + $0x3c0] sm:$0xff]  ;;  %v172_v62 = vld [vmem:[#allocation5 + $0x3f0] sm:$0xff] }
  0x43   :  { %1715 = vmatpush1.bf16.msra.mxu1 %v1714_v22  ;;  %v550_v63 = vld [vmem:[#allocation5 + $0xfc0] sm:$0xff]  ;;  %v1856_v0 = vpack.c.bf16 %v557_v57, %v551_v56  ;;  %v556_v1 = vld [vmem:[#allocation5 + $0xff0] sm:$0xff]  ;;  %v179_v2 = vld [vmem:[#allocation5 + $0x428] sm:$0xff]  ;;  %v1730_v6 = vpack.c.bf16 %v172_v62, %v166_v61 }
  0x44   :  { %1843 = vmatpush1.bf16.msra.mxu0 %v1842_v23  ;;  %1717 = vmatprep.subr.bf16.mxu1 %v1716_v24  ;;  %v185_v3 = vld [vmem:[#allocation5 + $0x458] sm:$0xff]  ;;  %v563_v4 = vld [vmem:[#allocation5 + $0x1028] sm:$0xff]  ;;  %v178_v7 = vld [vmem:[#allocation5 + $0x420] sm:$0xff]  ;;  %v1858_v8 = vpack.c.bf16 %v556_v1, %v550_v63 }
  0x45   :  { %1845 = vmatprep.subr.bf16.mxu0 %v1844_v28  ;;  %v569_v5 = vld [vmem:[#allocation5 + $0x1058] sm:$0xff]  ;;  %v1732_v9 = vpack.c.bf16 %v185_v3, %v179_v2  ;;  %v184_v10 = vld [vmem:[#allocation5 + $0x450] sm:$0xff]  ;;  %v562_v11 = vld [vmem:[#allocation5 + $0x1020] sm:$0xff] }
  0x46   :  { %v568_v12 = vld [vmem:[#allocation5 + $0x1050] sm:$0xff]  ;;  %v1860_v13 = vpack.c.bf16 %v569_v5, %v563_v4  ;;  %v191_v14 = vld [vmem:[#allocation5 + $0x488] sm:$0xff]  ;;  %v197_v15 = vld [vmem:[#allocation5 + $0x4b8] sm:$0xff]  ;;  %v1734_v20 = vpack.c.bf16 %v184_v10, %v178_v7 }
  0x47   :  { %1719 = vmatpush1.bf16.msra.mxu1 %v1718_v34  ;;  %v2608_v16 = vld [vmem:[#allocation2 + $0x8] sm:$0xff]  ;;  %v581_v18 = vld [vmem:[#allocation5 + $0x10b8] sm:$0xff]  ;;  %v1862_v21 = vpack.c.bf16 %v568_v12, %v562_v11  ;;  %v1736_v22 = vpack.c.bf16 %v197_v15, %v191_v14  ;;  %v190_v23 = vld [vmem:[#allocation5 + $0x480] sm:$0xff] }
  0x48   :  { %1847 = vmatpush1.bf16.msra.mxu0 %v1846_v35  ;;  %1721 = vmatprep.subr.bf16.mxu1 %v1720_v36  ;;  %v575_v17 = vld [vmem:[#allocation5 + $0x1088] sm:$0xff]  ;;  %v196_v24 = vld [vmem:[#allocation5 + $0x4b0] sm:$0xff]  ;;  %v574_v25 = vld [vmem:[#allocation5 + $0x1080] sm:$0xff] }
  0x49   :  { %1849 = vmatprep.subr.bf16.mxu0 %v1848_v40  ;;  %878 = vmatprep.mubr.f32.mxu1 %v2608_v16  ;;  %v43_v19 = vld [vmem:[#allocation2 + $0x28] sm:$0xff]  ;;  %v1864_v26 = vpack.c.bf16 %v581_v18, %v575_v17  ;;  %v580_v27 = vld [vmem:[#allocation5 + $0x10b0] sm:$0xff]  ;;  %v209_v29 = vld [vmem:[#allocation5 + $0x518] sm:$0xff]  ;;  %v1738_v32 = vpack.c.bf16 %v196_v24, %v190_v23 }
  0x4a   :  { %1020 = vmatprep.mubr.f32.mxu0 %v43_v19  ;;  %v203_v28 = vld [vmem:[#allocation5 + $0x4e8] sm:$0xff]  ;;  %v593_v31 = vld [vmem:[#allocation5 + $0x1118] sm:$0xff]  ;;  %v1866_v33 = vpack.c.bf16 %v580_v27, %v574_v25  ;;  %v202_v35 = vld [vmem:[#allocation5 + $0x4e0] sm:$0xff] }
  0x4b   :  { %1723 = vmatpush1.bf16.msra.mxu1 %v1722_v46  ;;  %v587_v30 = vld [vmem:[#allocation5 + $0x10e8] sm:$0xff]  ;;  %v1740_v34 = vpack.c.bf16 %v209_v29, %v203_v28  ;;  %v208_v36 = vld [vmem:[#allocation5 + $0x510] sm:$0xff]  ;;  %v586_v37 = vld [vmem:[#allocation5 + $0x10e0] sm:$0xff] }
  0x4c   :  { %1851 = vmatpush1.bf16.msra.mxu0 %v1850_v47  ;;  %1725 = vmatprep.subr.bf16.mxu1 %v1724_v48  ;;  %v1868_v38 = vpack.c.bf16 %v593_v31, %v587_v30  ;;  %v592_v39 = vld [vmem:[#allocation5 + $0x1110] sm:$0xff]  ;;  %v215_v40 = vld [vmem:[#allocation5 + $0x548] sm:$0xff]  ;;  %v221_v41 = vld [vmem:[#allocation5 + $0x578] sm:$0xff]  ;;  %v1742_v44 = vpack.c.bf16 %v208_v36, %v202_v35 }
  0x4d   :  { %1853 = vmatprep.subr.bf16.mxu0 %v1852_v52  ;;  %v599_v42 = vld [vmem:[#allocation5 + $0x1148] sm:$0xff]  ;;  %v605_v43 = vld [vmem:[#allocation5 + $0x1178] sm:$0xff]  ;;  %v1870_v45 = vpack.c.bf16 %v592_v39, %v586_v37  ;;  %v1744_v46 = vpack.c.bf16 %v221_v41, %v215_v40  ;;  %v214_v47 = vld [vmem:[#allocation5 + $0x540] sm:$0xff] }
  0x4e   :  { %v220_v48 = vld [vmem:[#allocation5 + $0x570] sm:$0xff]  ;;  %v598_v49 = vld [vmem:[#allocation5 + $0x1140] sm:$0xff]  ;;  %v1872_v50 = vpack.c.bf16 %v605_v43, %v599_v42  ;;  %v227_v52 = vld [vmem:[#allocation5 + $0x5a8] sm:$0xff] }
  0x4f   :  { %1727 = vmatpush1.bf16.msra.mxu1 %v1726_v58  ;;  %v604_v51 = vld [vmem:[#allocation5 + $0x1170] sm:$0xff]  ;;  %v233_v53 = vld [vmem:[#allocation5 + $0x5d8] sm:$0xff]  ;;  %v611_v54 = vld [vmem:[#allocation5 + $0x11a8] sm:$0xff]  ;;  %v1746_v56 = vpack.c.bf16 %v220_v48, %v214_v47 }
  0x50   :  { %1855 = vmatpush1.bf16.msra.mxu0 %v1854_v59  ;;  %1729 = vmatprep.subr.bf16.mxu1 %v1728_v60  ;;  %v617_v55 = vld [vmem:[#allocation5 + $0x11d8] sm:$0xff]  ;;  %v1874_v57 = vpack.c.bf16 %v604_v51, %v598_v49  ;;  %v1748_v58 = vpack.c.bf16 %v233_v53, %v227_v52  ;;  %v226_v59 = vld [vmem:[#allocation5 + $0x5a0] sm:$0xff]  ;;  %v232_v60 = vld [vmem:[#allocation5 + $0x5d0] sm:$0xff] }
  0x51   :  { %1857 = vmatprep.subr.bf16.mxu0 %v1856_v0  ;;  %v610_v61 = vld [vmem:[#allocation5 + $0x11a0] sm:$0xff]  ;;  %v1876_v62 = vpack.c.bf16 %v617_v55, %v611_v54  ;;  %v616_v63 = vld [vmem:[#allocation5 + $0x11d0] sm:$0xff]  ;;  %v239_v0 = vld [vmem:[#allocation5 + $0x608] sm:$0xff]  ;;  %v1750_v4 = vpack.c.bf16 %v232_v60, %v226_v59 }
  0x52   :  { %v245_v1 = vld [vmem:[#allocation5 + $0x638] sm:$0xff]  ;;  %v623_v2 = vld [vmem:[#allocation5 + $0x1208] sm:$0xff]  ;;  %v1878_v5 = vpack.c.bf16 %v616_v63, %v610_v61  ;;  %v238_v7 = vld [vmem:[#allocation5 + $0x600] sm:$0xff] }
  0x53   :  { %1731 = vmatpush1.bf16.msra.mxu1 %v1730_v6  ;;  %v629_v3 = vld [vmem:[#allocation5 + $0x1238] sm:$0xff]  ;;  %v1752_v6 = vpack.c.bf16 %v245_v1, %v239_v0  ;;  %v628_v11 = vld [vmem:[#allocation5 + $0x1230] sm:$0xff]  ;;  %v251_v12 = vld [vmem:[#allocation5 + $0x668] sm:$0xff] }
  0x54   :  { %1859 = vmatpush1.bf16.msra.mxu0 %v1858_v8  ;;  %1733 = vmatprep.subr.bf16.mxu1 %v1732_v9  ;;  %v244_v8 = vld [vmem:[#allocation5 + $0x630] sm:$0xff]  ;;  %v622_v9 = vld [vmem:[#allocation5 + $0x1200] sm:$0xff]  ;;  %v1880_v10 = vpack.c.bf16 %v629_v3, %v623_v2  ;;  %v635_v14 = vld [vmem:[#allocation5 + $0x1268] sm:$0xff] }
  0x55   :  { %1861 = vmatprep.subr.bf16.mxu0 %v1860_v13  ;;  %v257_v13 = vld [vmem:[#allocation5 + $0x698] sm:$0xff]  ;;  %v38_v17 = vld [vmem:[#allocation2] sm:$0xff]  ;;  %v1754_v18 = vpack.c.bf16 %v244_v8, %v238_v7  ;;  %v256_v23 = vld [vmem:[#allocation5 + $0x690] sm:$0xff] }
  0x56   :  { %v641_v15 = vld [vmem:[#allocation5 + $0x1298] sm:$0xff]  ;;  %v42_v19 = vld [vmem:[#allocation2 + $0x20] sm:$0xff]  ;;  %v263_v27 = vld [vmem:[#allocation5 + $0x6c8] sm:$0xff] }
  0x57   :  { %1735 = vmatpush1.bf16.msra.mxu1 %v1734_v20  ;;  %v1882_v20 = vpack.c.bf16 %v628_v11, %v622_v9  ;;  %v634_v24 = vld [vmem:[#allocation5 + $0x1260] sm:$0xff]  ;;  %v1884_v25 = vpack.c.bf16 %v641_v15, %v635_v14  ;;  %v269_v28 = vld [vmem:[#allocation5 + $0x6f8] sm:$0xff]  ;;  %v647_v29 = vld [vmem:[#allocation5 + $0x12c8] sm:$0xff] }
  0x58   :  { %1863 = vmatpush1.bf16.msra.mxu0 %v1862_v21  ;;  %1737 = vmatprep.subr.bf16.mxu1 %v1736_v22  ;;  %v1756_v21 = vpack.c.bf16 %v257_v13, %v251_v12  ;;  %v250_v22 = vld [vmem:[#allocation5 + $0x660] sm:$0xff]  ;;  %v653_v30 = vld [vmem:[#allocation5 + $0x12f8] sm:$0xff]  ;;  %v268_v35 = vld [vmem:[#allocation5 + $0x6f0] sm:$0xff] }
  0x59   :  { %1865 = vmatprep.subr.bf16.mxu0 %v1864_v26  ;;  %v640_v26 = vld [vmem:[#allocation5 + $0x1290] sm:$0xff]  ;;  %v1758_v31 = vpack.c.bf16 %v256_v23, %v250_v22  ;;  %v646_v36 = vld [vmem:[#allocation5 + $0x12c0] sm:$0xff]  ;;  %v1888_v37 = vpack.c.bf16 %v653_v30, %v647_v29  ;;  %v275_v39 = vld [vmem:[#allocation5 + $0x728] sm:$0xff] }
  0x5a   :  { %v281_v40 = vld [vmem:[#allocation5 + $0x758] sm:$0xff]  ;;  %v659_v41 = vld [vmem:[#allocation5 + $0x1328] sm:$0xff]  ;;  %v280_v47 = vld [vmem:[#allocation5 + $0x750] sm:$0xff] }
  0x5b   :  { %1739 = vmatpush1.bf16.msra.mxu1 %v1738_v32  ;;  %v1886_v32 = vpack.c.bf16 %v640_v26, %v634_v24  ;;  %v665_v42 = vld [vmem:[#allocation5 + $0x1358] sm:$0xff]  ;;  %v658_v48 = vld [vmem:[#allocation5 + $0x1320] sm:$0xff]  ;;  %v287_v51 = vld [vmem:[#allocation5 + $0x788] sm:$0xff] }
  0x5c   :  { %1867 = vmatpush1.bf16.msra.mxu0 %v1866_v33  ;;  %1741 = vmatprep.subr.bf16.mxu1 %v1740_v34  ;;  %v1760_v33 = vpack.c.bf16 %v269_v28, %v263_v27  ;;  %v262_v34 = vld [vmem:[#allocation5 + $0x6c0] sm:$0xff]  ;;  %v1892_v49 = vpack.c.bf16 %v665_v42, %v659_v41  ;;  %v293_v52 = vld [vmem:[#allocation5 + $0x7b8] sm:$0xff]  ;;  %v671_v53 = vld [vmem:[#allocation5 + $0x1388] sm:$0xff] }
  0x5d   :  { %1869 = vmatprep.subr.bf16.mxu0 %v1868_v38  ;;  %v652_v38 = vld [vmem:[#allocation5 + $0x12f0] sm:$0xff]  ;;  %v1762_v43 = vpack.c.bf16 %v268_v35, %v262_v34  ;;  %v677_v54 = vld [vmem:[#allocation5 + $0x13b8] sm:$0xff]  ;;  %v670_v60 = vld [vmem:[#allocation5 + $0x1380] sm:$0xff] }
  0x5e   :  { %v292_v59 = vld [vmem:[#allocation5 + $0x7b0] sm:$0xff]  ;;  %v1896_v61 = vpack.c.bf16 %v677_v54, %v671_v53  ;;  %v299_v63 = vld [vmem:[#allocation5 + $0x7e8] sm:$0xff]  ;;  %v305_v0 = vld [vmem:[#allocation5 + $0x818] sm:$0xff] }
  0x5f   :  { %1743 = vmatpush1.bf16.msra.mxu1 %v1742_v44  ;;  %v1890_v44 = vpack.c.bf16 %v652_v38, %v646_v36  ;;  %v683_v1 = vld [vmem:[#allocation5 + $0x13e8] sm:$0xff]  ;;  %v689_v2 = vld [vmem:[#allocation5 + $0x1418] sm:$0xff]  ;;  %v304_v7 = vld [vmem:[#allocation5 + $0x810] sm:$0xff] }
  0x60   :  { %1871 = vmatpush1.bf16.msra.mxu0 %v1870_v45  ;;  %1745 = vmatprep.subr.bf16.mxu1 %v1744_v46  ;;  %v1764_v45 = vpack.c.bf16 %v281_v40, %v275_v39  ;;  %v274_v46 = vld [vmem:[#allocation5 + $0x720] sm:$0xff]  ;;  %v1900_v9 = vpack.c.bf16 %v689_v2, %v683_v1  ;;  %v311_v11 = vld [vmem:[#allocation5 + $0x848] sm:$0xff]  ;;  %v317_v12 = vld [vmem:[#allocation5 + $0x878] sm:$0xff] }
  0x61   :  { %1873 = vmatprep.subr.bf16.mxu0 %v1872_v50  ;;  %v664_v50 = vld [vmem:[#allocation5 + $0x1350] sm:$0xff]  ;;  %v1766_v55 = vpack.c.bf16 %v280_v47, %v274_v46  ;;  %v682_v8 = vld [vmem:[#allocation5 + $0x13e0] sm:$0xff]  ;;  %v695_v13 = vld [vmem:[#allocation5 + $0x1448] sm:$0xff] }
  0x62   :  { %v701_v14 = vld [vmem:[#allocation5 + $0x1478] sm:$0xff]  ;;  %v700_v22 = vld [vmem:[#allocation5 + $0x1470] sm:$0xff]  ;;  %v323_v24 = vld [vmem:[#allocation5 + $0x8a8] sm:$0xff] }
  0x63   :  { %1747 = vmatpush1.bf16.msra.mxu1 %v1746_v56  ;;  %v1894_v56 = vpack.c.bf16 %v664_v50, %v658_v48  ;;  %v1904_v23 = vpack.c.bf16 %v701_v14, %v695_v13  ;;  %v2611_v26 = vld [vmem:[#allocation2 + $0x18] sm:$0xff]  ;;  %v707_v27 = vld [vmem:[#allocation5 + $0x14a8] sm:$0xff]  ;;  %v328_v34 = vld [vmem:[#allocation5 + $0x8d0] sm:$0xff] }
  0x64   :  { %1875 = vmatpush1.bf16.msra.mxu0 %v1874_v57  ;;  %1749 = vmatprep.subr.bf16.mxu1 %v1748_v58  ;;  %v1768_v57 = vpack.c.bf16 %v293_v52, %v287_v51  ;;  %v286_v58 = vld [vmem:[#allocation5 + $0x780] sm:$0xff]  ;;  %v713_v28 = vld [vmem:[#allocation5 + $0x14d8] sm:$0xff]  ;;  %v335_v38 = vld [vmem:[#allocation5 + $0x908] sm:$0xff] }
  0x65   :  { %1877 = vmatprep.subr.bf16.mxu0 %v1876_v62  ;;  %v676_v62 = vld [vmem:[#allocation5 + $0x13b0] sm:$0xff]  ;;  %v1770_v3 = vpack.c.bf16 %v292_v59, %v286_v58  ;;  %v45_v29 = vld [vmem:[#allocation2 + $0x38] sm:$0xff]  ;;  %v706_v35 = vld [vmem:[#allocation5 + $0x14a0] sm:$0xff]  ;;  %v1908_v36 = vpack.c.bf16 %v713_v28, %v707_v27 }
  0x66   :  { %v341_v39 = vld [vmem:[#allocation5 + $0x938] sm:$0xff]  ;;  %v719_v40 = vld [vmem:[#allocation5 + $0x1508] sm:$0xff]  ;;  %v340_v46 = vld [vmem:[#allocation5 + $0x930] sm:$0xff] }
  0x67   :  { %1751 = vmatpush1.bf16.msra.mxu1 %v1750_v4  ;;  %v1898_v4 = vpack.c.bf16 %v676_v62, %v670_v60  ;;  %v725_v41 = vld [vmem:[#allocation5 + $0x1538] sm:$0xff]  ;;  %v718_v47 = vld [vmem:[#allocation5 + $0x1500] sm:$0xff]  ;;  %v347_v50 = vld [vmem:[#allocation5 + $0x968] sm:$0xff] }
  0x68   :  { %1879 = vmatpush1.bf16.msra.mxu0 %v1878_v5  ;;  %1753 = vmatprep.subr.bf16.mxu1 %v1752_v6  ;;  %v1772_v5 = vpack.c.bf16 %v305_v0, %v299_v63  ;;  %v298_v6 = vld [vmem:[#allocation5 + $0x7e0] sm:$0xff]  ;;  %v1912_v48 = vpack.c.bf16 %v725_v41, %v719_v40  ;;  %v353_v51 = vld [vmem:[#allocation5 + $0x998] sm:$0xff]  ;;  %v731_v52 = vld [vmem:[#allocation5 + $0x1568] sm:$0xff] }
  0x69   :  { %1881 = vmatprep.subr.bf16.mxu0 %v1880_v10  ;;  %v688_v10 = vld [vmem:[#allocation5 + $0x1410] sm:$0xff]  ;;  %v1774_v15 = vpack.c.bf16 %v304_v7, %v298_v6  ;;  %v737_v53 = vld [vmem:[#allocation5 + $0x1598] sm:$0xff]  ;;  %v730_v59 = vld [vmem:[#allocation5 + $0x1560] sm:$0xff] }
  0x6a   :  { %879 = vmatmul.mubr.f32.vlgmr.msra.gmra.mrb[0].mxu1 %v38_v17  ;;  %v310_v17 = vld [vmem:[#allocation5 + $0x840] sm:$0xff]  ;;  %v352_v58 = vld [vmem:[#allocation5 + $0x990] sm:$0xff]  ;;  %v1916_v60 = vpack.c.bf16 %v737_v53, %v731_v52  ;;  %v359_v62 = vld [vmem:[#allocation5 + $0x9c8] sm:$0xff] }
  0x6b   :  { %1755 = vmatpush1.bf16.msra.mxu1 %v1754_v18  ;;  %1021 = vmatmul.mubr.f32.vlgmr.msra.gmra.mrb[0].mxu0 %v42_v19  ;;  %v1902_v18 = vpack.c.bf16 %v688_v10, %v682_v8  ;;  %v1776_v19 = vpack.c.bf16 %v317_v12, %v311_v11  ;;  %v365_v63 = vld [vmem:[#allocation5 + $0x9f8] sm:$0xff]  ;;  %v743_v0 = vld [vmem:[#allocation5 + $0x15c8] sm:$0xff]  ;;  %v364_v6 = vld [vmem:[#allocation5 + $0x9f0] sm:$0xff] }
  0x6c   :  { %1883 = vmatpush1.bf16.msra.mxu0 %v1882_v20  ;;  %1757 = vmatprep.subr.bf16.mxu1 %v1756_v21  ;;  %v316_v20 = vld [vmem:[#allocation5 + $0x870] sm:$0xff]  ;;  %v694_v21 = vld [vmem:[#allocation5 + $0x1440] sm:$0xff]  ;;  %v749_v1 = vld [vmem:[#allocation5 + $0x15f8] sm:$0xff] }
  0x6d   :  { %1885 = vmatprep.subr.bf16.mxu0 %v1884_v25  ;;  %v329_v25 = vld [vmem:[#allocation5 + $0x8d8] sm:$0xff]  ;;  %949 = vmatprep.mubr.f32.mxu1 %v2611_v26  ;;  %v1778_v30 = vpack.c.bf16 %v316_v20, %v310_v17  ;;  %v742_v7 = vld [vmem:[#allocation5 + $0x15c0] sm:$0xff]  ;;  %v1920_v8 = vpack.c.bf16 %v749_v1, %v743_v0  ;;  %v371_v10 = vld [vmem:[#allocation5 + $0xa28] sm:$0xff] }
  0x6e   :  { %1091 = vmatprep.mubr.f32.mxu0 %v45_v29  ;;  %v377_v11 = vld [vmem:[#allocation5 + $0xa58] sm:$0xff]  ;;  %v755_v12 = vld [vmem:[#allocation5 + $0x1628] sm:$0xff]  ;;  %v754_v20 = vld [vmem:[#allocation5 + $0x1620] sm:$0xff] }
  0x6f   :  { %1759 = vmatpush1.bf16.msra.mxu1 %v1758_v31  ;;  %v1906_v31 = vpack.c.bf16 %v700_v22, %v694_v21  ;;  %v761_v13 = vld [vmem:[#allocation5 + $0x1658] sm:$0xff]  ;;  %v1796_v17 = vpack.c.bf16 %v377_v11, %v371_v10  ;;  %v760_v22 = vld [vmem:[#allocation5 + $0x1650] sm:$0xff]  ;;  %v51_v10 = vld [vmem:[#allocation5 + $0x28] sm:$0xff] }
  0x70   :  { %1887 = vmatpush1.bf16.msra.mxu0 %v1886_v32  ;;  %1761 = vmatprep.subr.bf16.mxu1 %v1760_v33  ;;  %v1780_v32 = vpack.c.bf16 %v329_v25, %v323_v24  ;;  %v322_v33 = vld [vmem:[#allocation5 + $0x8a0] sm:$0xff]  ;;  %v1924_v21 = vpack.c.bf16 %v761_v13, %v755_v12  ;;  %v389_v24 = vld [vmem:[#allocation5 + $0xab8] sm:$0xff]  ;;  %v767_v25 = vld [vmem:[#allocation5 + $0x1688] sm:$0xff]  ;;  %v1926_v29 = vpack.c.bf16 %v760_v22, %v754_v20 }
  0x71   :  { %1889 = vmatprep.subr.bf16.mxu0 %v1888_v37  ;;  %v712_v37 = vld [vmem:[#allocation5 + $0x14d0] sm:$0xff]  ;;  %v1782_v42 = vpack.c.bf16 %v328_v34, %v322_v33  ;;  %v773_v27 = vld [vmem:[#allocation5 + $0x16b8] sm:$0xff]  ;;  %v766_v33 = vld [vmem:[#allocation5 + $0x1680] sm:$0xff] }
  0x72   :  { %v1928_v34 = vpack.c.bf16 %v773_v27, %v767_v25  ;;  %v57_v11 = vld [vmem:[#allocation5 + $0x58] sm:$0xff]  ;;  %v56_v20 = vld [vmem:[#allocation5 + $0x50] sm:$0xff]  ;;  %v67_v22 = vld [vmem:[#allocation5 + $0xa8] sm:$0xff] }
  0x73   :  { %1763 = vmatpush1.bf16.msra.mxu1 %v1762_v43  ;;  %v1910_v43 = vpack.c.bf16 %v712_v37, %v706_v35  ;;  %v772_v35 = vld [vmem:[#allocation5 + $0x16b0] sm:$0xff]  ;;  %v401_v37 = vld [vmem:[#allocation5 + $0xb18] sm:$0xff] }
  0x74   :  { %1891 = vmatpush1.bf16.msra.mxu0 %v1890_v44  ;;  %1765 = vmatprep.subr.bf16.mxu1 %v1764_v45  ;;  %v1784_v44 = vpack.c.bf16 %v341_v39, %v335_v38  ;;  %v334_v45 = vld [vmem:[#allocation5 + $0x900] sm:$0xff]  ;;  %v779_v38 = vld [vmem:[#allocation5 + $0x16e8] sm:$0xff]  ;;  %v785_v39 = vld [vmem:[#allocation5 + $0x1718] sm:$0xff]  ;;  %v1930_v41 = vpack.c.bf16 %v772_v35, %v766_v33 }
  0x75   :  { %1893 = vmatprep.subr.bf16.mxu0 %v1892_v49  ;;  %v724_v49 = vld [vmem:[#allocation5 + $0x1530] sm:$0xff]  ;;  %v1786_v54 = vpack.c.bf16 %v340_v46, %v334_v45  ;;  %v778_v45 = vld [vmem:[#allocation5 + $0x16e0] sm:$0xff]  ;;  %v1932_v46 = vpack.c.bf16 %v785_v39, %v779_v38  ;;  %v75_v38 = vld [vmem:[#allocation5 + $0xe8] sm:$0xff] }
  0x76   :  { %v40_v25 = vld [vmem:[#allocation2 + $0x10] sm:$0xff]  ;;  %v62_v33 = vld [vmem:[#allocation5 + $0x80] sm:$0xff]  ;;  %v81_v39 = vld [vmem:[#allocation5 + $0x118] sm:$0xff] }
  0x77   :  { %1767 = vmatpush1.bf16.msra.mxu1 %v1766_v55  ;;  %v1914_v55 = vpack.c.bf16 %v724_v49, %v718_v47  ;;  %v784_v47 = vld [vmem:[#allocation5 + $0x1710] sm:$0xff]  ;;  %v413_v49 = vld [vmem:[#allocation5 + $0xb78] sm:$0xff] }
  0x78   :  { %1895 = vmatpush1.bf16.msra.mxu0 %v1894_v56  ;;  %1769 = vmatprep.subr.bf16.mxu1 %v1768_v57  ;;  %v1788_v56 = vpack.c.bf16 %v353_v51, %v347_v50  ;;  %v346_v57 = vld [vmem:[#allocation5 + $0x960] sm:$0xff]  ;;  %v791_v50 = vld [vmem:[#allocation5 + $0x1748] sm:$0xff]  ;;  %v797_v51 = vld [vmem:[#allocation5 + $0x1778] sm:$0xff]  ;;  %v1934_v53 = vpack.c.bf16 %v784_v47, %v778_v45 }
  0x79   :  { %1897 = vmatprep.subr.bf16.mxu0 %v1896_v61  ;;  %v736_v61 = vld [vmem:[#allocation5 + $0x1590] sm:$0xff]  ;;  %v1790_v2 = vpack.c.bf16 %v352_v58, %v346_v57  ;;  %v790_v57 = vld [vmem:[#allocation5 + $0x1740] sm:$0xff]  ;;  %v1936_v58 = vpack.c.bf16 %v797_v51, %v791_v50  ;;  %v87_v50 = vld [vmem:[#allocation5 + $0x148] sm:$0xff] }
  0x7a   :  { %v44_v27 = vld [vmem:[#allocation2 + $0x30] sm:$0xff]  ;;  %v74_v45 = vld [vmem:[#allocation5 + $0xe0] sm:$0xff]  ;;  %v93_v51 = vld [vmem:[#allocation5 + $0x178] sm:$0xff] }
  0x7b   :  { %1771 = vmatpush1.bf16.msra.mxu1 %v1770_v3  ;;  %v1918_v3 = vpack.c.bf16 %v736_v61, %v730_v59  ;;  %v796_v59 = vld [vmem:[#allocation5 + $0x1770] sm:$0xff]  ;;  %v425_v61 = vld [vmem:[#allocation5 + $0xbd8] sm:$0xff] }
  0x7c   :  { %1899 = vmatpush1.bf16.msra.mxu0 %v1898_v4  ;;  %1773 = vmatprep.subr.bf16.mxu1 %v1772_v5  ;;  %v1792_v4 = vpack.c.bf16 %v365_v63, %v359_v62  ;;  %v358_v5 = vld [vmem:[#allocation5 + $0x9c0] sm:$0xff]  ;;  %v803_v62 = vld [vmem:[#allocation5 + $0x17a8] sm:$0xff]  ;;  %v809_v63 = vld [vmem:[#allocation5 + $0x17d8] sm:$0xff]  ;;  %v1938_v1 = vpack.c.bf16 %v796_v59, %v790_v57 }
  0x7d   :  { %1901 = vmatprep.subr.bf16.mxu0 %v1900_v9  ;;  %v748_v9 = vld [vmem:[#allocation5 + $0x15f0] sm:$0xff]  ;;  %v1794_v14 = vpack.c.bf16 %v364_v6, %v358_v5  ;;  %v802_v5 = vld [vmem:[#allocation5 + $0x17a0] sm:$0xff]  ;;  %v1940_v6 = vpack.c.bf16 %v809_v63, %v803_v62  ;;  %v99_v62 = vld [vmem:[#allocation5 + $0x1a8] sm:$0xff] }
  0x7e   :  { %v68_v35 = vld [vmem:[#allocation5 + $0xb0] sm:$0xff]  ;;  %v86_v57 = vld [vmem:[#allocation5 + $0x140] sm:$0xff]  ;;  %v105_v63 = vld [vmem:[#allocation5 + $0x1d8] sm:$0xff] }
  0x7f   :  { %1775 = vmatpush1.bf16.msra.mxu1 %v1774_v15  ;;  %v1922_v15 = vpack.c.bf16 %v748_v9, %v742_v7  ;;  %v808_v7 = vld [vmem:[#allocation5 + $0x17d0] sm:$0xff]  ;;  %v55_v9 = vld [vmem:[#allocation5 + $0x48] sm:$0xff] }
  0x80   :  { %1903 = vmatpush1.bf16.msra.mxu0 %v1902_v18  ;;  %1777 = vmatprep.subr.bf16.mxu1 %v1776_v19  ;;  %v370_v18 = vld [vmem:[#allocation5 + $0xa20] sm:$0xff]  ;;  %v376_v19 = vld [vmem:[#allocation5 + $0xa50] sm:$0xff]  ;;  %v1942_v13 = vpack.c.bf16 %v808_v7, %v802_v5  ;;  %v2216_v5 = vpack.c.bf16 %v105_v63, %v99_v62  ;;  %v109_v7 = vld [vmem:[#allocation5 + $0x1f8] sm:$0xff] }
  0x81   :  { %1905 = vmatprep.subr.bf16.mxu0 %v1904_v23  ;;  %v383_v23 = vld [vmem:[#allocation5 + $0xa88] sm:$0xff]  ;;  %v1798_v28 = vpack.c.bf16 %v376_v19, %v370_v18  ;;  %v50_v18 = vld [vmem:[#allocation5 + $0x20] sm:$0xff]  ;;  %v2200_v19 = vpack.c.bf16 %v57_v11, %v51_v10  ;;  %v80_v47 = vld [vmem:[#allocation5 + $0x110] sm:$0xff] }
  0x82   :  { %v92_v59 = vld [vmem:[#allocation5 + $0x170] sm:$0xff]  ;;  %v117_v10 = vld [vmem:[#allocation5 + $0x238] sm:$0xff] }
  0x83   :  { %1779 = vmatpush1.bf16.msra.mxu1 %v1778_v30  ;;  %v1800_v30 = vpack.c.bf16 %v389_v24, %v383_v23  ;;  %v63_v23 = vld [vmem:[#allocation5 + $0x88] sm:$0xff]  ;;  %v69_v24 = vld [vmem:[#allocation5 + $0xb8] sm:$0xff] }
  0x84   :  { %1907 = vmatpush1.bf16.msra.mxu0 %v1906_v31  ;;  %1781 = vmatprep.subr.bf16.mxu1 %v1780_v32  ;;  %v382_v31 = vld [vmem:[#allocation5 + $0xa80] sm:$0xff]  ;;  %v388_v32 = vld [vmem:[#allocation5 + $0xab0] sm:$0xff] }
  0x85   :  { %1909 = vmatprep.subr.bf16.mxu0 %v1908_v36  ;;  %v395_v36 = vld [vmem:[#allocation5 + $0xae8] sm:$0xff]  ;;  %v1802_v40 = vpack.c.bf16 %v388_v32, %v382_v31  ;;  %v60_v31 = vld [vmem:[#allocation5 + $0x70] sm:$0xff]  ;;  %v66_v32 = vld [vmem:[#allocation5 + $0xa0] sm:$0xff] }
  0x87   :  { %1783 = vmatpush1.bf16.msra.mxu1 %v1782_v42  ;;  %v1804_v42 = vpack.c.bf16 %v401_v37, %v395_v36  ;;  %v73_v36 = vld [vmem:[#allocation5 + $0xd8] sm:$0xff]  ;;  %v79_v37 = vld [vmem:[#allocation5 + $0x108] sm:$0xff] }
  0x88   :  { %1911 = vmatpush1.bf16.msra.mxu0 %v1910_v43  ;;  %1785 = vmatprep.subr.bf16.mxu1 %v1784_v44  ;;  %v394_v43 = vld [vmem:[#allocation5 + $0xae0] sm:$0xff]  ;;  %v400_v44 = vld [vmem:[#allocation5 + $0xb10] sm:$0xff] }
  0x89   :  { %1913 = vmatprep.subr.bf16.mxu0 %v1912_v48  ;;  %v407_v48 = vld [vmem:[#allocation5 + $0xb48] sm:$0xff]  ;;  %v1806_v52 = vpack.c.bf16 %v400_v44, %v394_v43  ;;  %v72_v43 = vld [vmem:[#allocation5 + $0xd0] sm:$0xff]  ;;  %v78_v44 = vld [vmem:[#allocation5 + $0x100] sm:$0xff] }
  0x8b   :  { %1787 = vmatpush1.bf16.msra.mxu1 %v1786_v54  ;;  %v1808_v54 = vpack.c.bf16 %v413_v49, %v407_v48  ;;  %v85_v48 = vld [vmem:[#allocation5 + $0x138] sm:$0xff]  ;;  %v91_v49 = vld [vmem:[#allocation5 + $0x168] sm:$0xff] }
  0x8c   :  { %1915 = vmatpush1.bf16.msra.mxu0 %v1914_v55  ;;  %1789 = vmatprep.subr.bf16.mxu1 %v1788_v56  ;;  %v406_v55 = vld [vmem:[#allocation5 + $0xb40] sm:$0xff]  ;;  %v412_v56 = vld [vmem:[#allocation5 + $0xb70] sm:$0xff] }
  0x8d   :  { %1917 = vmatprep.subr.bf16.mxu0 %v1916_v60  ;;  %v419_v60 = vld [vmem:[#allocation5 + $0xba8] sm:$0xff]  ;;  %v1810_v0 = vpack.c.bf16 %v412_v56, %v406_v55  ;;  %v84_v55 = vld [vmem:[#allocation5 + $0x130] sm:$0xff]  ;;  %v90_v56 = vld [vmem:[#allocation5 + $0x160] sm:$0xff] }
  0x8f   :  { %1791 = vmatpush1.bf16.msra.mxu1 %v1790_v2  ;;  %v1812_v2 = vpack.c.bf16 %v425_v61, %v419_v60  ;;  %v97_v60 = vld [vmem:[#allocation5 + $0x198] sm:$0xff]  ;;  %v103_v61 = vld [vmem:[#allocation5 + $0x1c8] sm:$0xff] }
  0x90   :  { %1919 = vmatpush1.bf16.msra.mxu0 %v1918_v3  ;;  %1793 = vmatprep.subr.bf16.mxu1 %v1792_v4  ;;  %v418_v3 = vld [vmem:[#allocation5 + $0xba0] sm:$0xff]  ;;  %v424_v4 = vld [vmem:[#allocation5 + $0xbd0] sm:$0xff] }
  0x91   :  { %1921 = vmatprep.subr.bf16.mxu0 %v1920_v8  ;;  %v49_v8 = vld [vmem:[#allocation5 + $0x18] sm:$0xff]  ;;  %v1814_v12 = vpack.c.bf16 %v424_v4, %v418_v3  ;;  %v102_v3 = vld [vmem:[#allocation5 + $0x1c0] sm:$0xff] }
  0x92   :  { %v98_v4 = vld [vmem:[#allocation5 + $0x1a0] sm:$0xff] }
  0x93   :  { %1795 = vmatpush1.bf16.msra.mxu1 %v1794_v14  ;;  %v1944_v14 = vpack.c.bf16 %v55_v9, %v49_v8  ;;  %v115_v8 = vld [vmem:[#allocation5 + $0x228] sm:$0xff] }
  0x94   :  { %1923 = vmatpush1.bf16.msra.mxu0 %v1922_v15  ;;  %1797 = vmatprep.subr.bf16.mxu1 %v1796_v17  ;;  %v48_v15 = vld [vmem:[#allocation5 + $0x10] sm:$0xff]  ;;  %v54_v17 = vld [vmem:[#allocation5 + $0x40] sm:$0xff]  ;;  %v111_v9 = vld [vmem:[#allocation5 + $0x208] sm:$0xff] }
  0x95   :  { %1925 = vmatprep.subr.bf16.mxu0 %v1924_v21  ;;  %v61_v21 = vld [vmem:[#allocation5 + $0x78] sm:$0xff] }
  0x97   :  { %1799 = vmatpush1.bf16.msra.mxu1 %v1798_v28  ;;  %v1946_v28 = vpack.c.bf16 %v54_v17, %v48_v15  ;;  %v114_v15 = vld [vmem:[#allocation5 + $0x220] sm:$0xff] }
  0x98   :  { %1927 = vmatpush1.bf16.msra.mxu0 %v1926_v29  ;;  %1801 = vmatprep.subr.bf16.mxu1 %v1800_v30  ;;  %v2202_v29 = vpack.c.bf16 %v56_v20, %v50_v18  ;;  %v1948_v30 = vpack.c.bf16 %v67_v22, %v61_v21  ;;  %v110_v17 = vld [vmem:[#allocation5 + $0x200] sm:$0xff]  ;;  %v2220_v18 = vpack.c.bf16 %v117_v10, %v111_v9  ;;  %v121_v20 = vld [vmem:[#allocation5 + $0x258] sm:$0xff]  ;;  %v127_v21 = vld [vmem:[#allocation5 + $0x288] sm:$0xff] }
  0x99   :  { %1929 = vmatprep.subr.bf16.mxu0 %v1928_v34  ;;  %v2204_v34 = vpack.c.bf16 %v69_v24, %v63_v23  ;;  %v123_v22 = vld [vmem:[#allocation5 + $0x268] sm:$0xff]  ;;  %v129_v23 = vld [vmem:[#allocation5 + $0x298] sm:$0xff] }
  0x9b   :  { %1803 = vmatpush1.bf16.msra.mxu1 %v1802_v40  ;;  %v1950_v40 = vpack.c.bf16 %v66_v32, %v60_v31  ;;  %v2224_v31 = vpack.c.bf16 %v129_v23, %v123_v22  ;;  %v128_v32 = vld [vmem:[#allocation5 + $0x290] sm:$0xff] }
  0x9c   :  { %1931 = vmatpush1.bf16.msra.mxu0 %v1930_v41  ;;  %1805 = vmatprep.subr.bf16.mxu1 %v1804_v42  ;;  %v2206_v41 = vpack.c.bf16 %v68_v35, %v62_v33  ;;  %v1952_v42 = vpack.c.bf16 %v79_v37, %v73_v36  ;;  %v133_v33 = vld [vmem:[#allocation5 + $0x2b8] sm:$0xff]  ;;  %v135_v35 = vld [vmem:[#allocation5 + $0x2c8] sm:$0xff] }
  0x9d   :  { %1933 = vmatprep.subr.bf16.mxu0 %v1932_v46  ;;  %v2208_v46 = vpack.c.bf16 %v81_v39, %v75_v38  ;;  %v141_v36 = vld [vmem:[#allocation5 + $0x2f8] sm:$0xff] }
  0x9f   :  { %1807 = vmatpush1.bf16.msra.mxu1 %v1806_v52  ;;  %v1954_v52 = vpack.c.bf16 %v78_v44, %v72_v43  ;;  %v2228_v43 = vpack.c.bf16 %v141_v36, %v135_v35  ;;  %v140_v44 = vld [vmem:[#allocation5 + $0x2f0] sm:$0xff] }
  0xa0   :  { %1935 = vmatpush1.bf16.msra.mxu0 %v1934_v53  ;;  %1809 = vmatprep.subr.bf16.mxu1 %v1808_v54  ;;  %v2210_v53 = vpack.c.bf16 %v80_v47, %v74_v45  ;;  %v1956_v54 = vpack.c.bf16 %v91_v49, %v85_v48  ;;  %v145_v45 = vld [vmem:[#allocation5 + $0x318] sm:$0xff]  ;;  %v147_v47 = vld [vmem:[#allocation5 + $0x328] sm:$0xff] }
  0xa1   :  { %1937 = vmatprep.subr.bf16.mxu0 %v1936_v58  ;;  %v2212_v58 = vpack.c.bf16 %v93_v51, %v87_v50  ;;  %v153_v48 = vld [vmem:[#allocation5 + $0x358] sm:$0xff] }
  0xa3   :  { %1811 = vmatpush1.bf16.msra.mxu1 %v1810_v0  ;;  %v1958_v0 = vpack.c.bf16 %v90_v56, %v84_v55  ;;  %v2232_v55 = vpack.c.bf16 %v153_v48, %v147_v47  ;;  %v152_v56 = vld [vmem:[#allocation5 + $0x350] sm:$0xff] }
  0xa4   :  { %1939 = vmatpush1.bf16.msra.mxu0 %v1938_v1  ;;  %1813 = vmatprep.subr.bf16.mxu1 %v1812_v2  ;;  %v1960_v1 = vpack.c.bf16 %v103_v61, %v97_v60  ;;  %v96_v2 = vld [vmem:[#allocation5 + $0x190] sm:$0xff]  ;;  %v165_v60 = vld [vmem:[#allocation5 + $0x3b8] sm:$0xff] }
  0xa5   :  { %1941 = vmatprep.subr.bf16.mxu0 %v1940_v6  ;;  %v104_v6 = vld [vmem:[#allocation5 + $0x1d0] sm:$0xff]  ;;  %v1962_v11 = vpack.c.bf16 %v102_v3, %v96_v2 }
  0xa6   :  { %v164_v3 = vld [vmem:[#allocation5 + $0x3b0] sm:$0xff] }
  0xa7   :  { %1815 = vmatpush1.bf16.msra.mxu1 %v1814_v12  ;;  %v2218_v12 = vpack.c.bf16 %v104_v6, %v98_v4  ;;  %v169_v4 = vld [vmem:[#allocation5 + $0x3d8] sm:$0xff]  ;;  %v171_v6 = vld [vmem:[#allocation5 + $0x3e8] sm:$0xff] }
  0xa8   :  { %1943 = vmatpush1.bf16.msra.mxu0 %v1942_v13  ;;  %1945 = vmatprep.subr.bf16.mxu1 %v1944_v14  ;;  %v1964_v13 = vpack.c.bf16 %v115_v8, %v109_v7  ;;  %v108_v14 = vld [vmem:[#allocation5 + $0x1f0] sm:$0xff]  ;;  %v177_v7 = vld [vmem:[#allocation5 + $0x418] sm:$0xff] }
  0xa9   :  { %2201 = vmatprep.subr.bf16.mxu0 %v2200_v19  ;;  %v116_v19 = vld [vmem:[#allocation5 + $0x230] sm:$0xff]  ;;  %v1966_v24 = vpack.c.bf16 %v114_v15, %v108_v14  ;;  %v2240_v14 = vpack.c.bf16 %v177_v7, %v171_v6 }
  0xaa   :  { %950 = vmatmul.mubr.f32.vlgmr.msra.gmra.mrb[0].mxu1 %v40_v25  ;;  %v2222_v25 = vpack.c.bf16 %v116_v19, %v110_v17  ;;  %v176_v15 = vld [vmem:[#allocation5 + $0x410] sm:$0xff]  ;;  %v181_v17 = vld [vmem:[#allocation5 + $0x438] sm:$0xff]  ;;  %v183_v19 = vld [vmem:[#allocation5 + $0x448] sm:$0xff] }
  0xab   :  { %1092 = vmatmul.mubr.f32.vlgmr.msra.gmra.mrb[0].mxu0 %v44_v27  ;;  %1947 = vmatpush1.bf16.msra.mxu1 %v1946_v28  ;;  %v1968_v27 = vpack.c.bf16 %v127_v21, %v121_v20  ;;  %v120_v28 = vld [vmem:[#allocation5 + $0x250] sm:$0xff]  ;;  %v189_v20 = vld [vmem:[#allocation5 + $0x478] sm:$0xff] }
  0xac   :  { %2203 = vmatpush1.bf16.msra.mxu0 %v2202_v29  ;;  %1949 = vmatprep.subr.bf16.mxu1 %v1948_v30  ;;  %v126_v29 = vld [vmem:[#allocation5 + $0x280] sm:$0xff] }
  0xad   :  { %2205 = vmatprep.subr.bf16.mxu0 %v2204_v34  ;;  %1162 = vmatprep.mubr.f32.mxu1 %v2608_v16  ;;  %v122_v30 = vld [vmem:[#allocation5 + $0x260] sm:$0xff]  ;;  %v139_v34 = vld [vmem:[#allocation5 + $0x2e8] sm:$0xff]  ;;  %v1970_v37 = vpack.c.bf16 %v126_v29, %v120_v28  ;;  %v2244_v28 = vpack.c.bf16 %v189_v20, %v183_v19  ;;  %v188_v29 = vld [vmem:[#allocation5 + $0x470] sm:$0xff] }
  0xae   :  { %1446 = vmatprep.mubr.f32.mxu0 %v2608_v16  ;;  %v2214_v16 = vpack.c.bf16 %v92_v59, %v86_v57  ;;  %v2226_v38 = vpack.c.bf16 %v128_v32, %v122_v30  ;;  %v1972_v39 = vpack.c.bf16 %v139_v34, %v133_v33  ;;  %v157_v57 = vld [vmem:[#allocation5 + $0x378] sm:$0xff]  ;;  %v159_v59 = vld [vmem:[#allocation5 + $0x388] sm:$0xff] }
  0xaf   :  { %1951 = vmatpush1.bf16.msra.mxu1 %v1950_v40  ;;  %v132_v40 = vld [vmem:[#allocation5 + $0x2b0] sm:$0xff]  ;;  %v2236_v2 = vpack.c.bf16 %v165_v60, %v159_v59  ;;  %v193_v30 = vld [vmem:[#allocation5 + $0x498] sm:$0xff]  ;;  %v195_v32 = vld [vmem:[#allocation5 + $0x4a8] sm:$0xff] }
  0xb0   :  { %2207 = vmatpush1.bf16.msra.mxu0 %v2206_v41  ;;  %1953 = vmatprep.subr.bf16.mxu1 %v1952_v42  ;;  %v138_v41 = vld [vmem:[#allocation5 + $0x2e0] sm:$0xff]  ;;  %v201_v33 = vld [vmem:[#allocation5 + $0x4d8] sm:$0xff] }
  0xb1   :  { %2209 = vmatprep.subr.bf16.mxu0 %v2208_v46  ;;  %v134_v42 = vld [vmem:[#allocation5 + $0x2c0] sm:$0xff]  ;;  %v151_v46 = vld [vmem:[#allocation5 + $0x348] sm:$0xff]  ;;  %v1974_v49 = vpack.c.bf16 %v138_v41, %v132_v40  ;;  %v2248_v40 = vpack.c.bf16 %v201_v33, %v195_v32  ;;  %v200_v41 = vld [vmem:[#allocation5 + $0x4d0] sm:$0xff] }
  0xb2   :  { %v2230_v50 = vpack.c.bf16 %v140_v44, %v134_v42  ;;  %v1976_v51 = vpack.c.bf16 %v151_v46, %v145_v45  ;;  %v205_v42 = vld [vmem:[#allocation5 + $0x4f8] sm:$0xff]  ;;  %v207_v44 = vld [vmem:[#allocation5 + $0x508] sm:$0xff] }
  0xb3   :  { %1955 = vmatpush1.bf16.msra.mxu1 %v1954_v52  ;;  %v144_v52 = vld [vmem:[#allocation5 + $0x310] sm:$0xff]  ;;  %v213_v45 = vld [vmem:[#allocation5 + $0x538] sm:$0xff] }
  0xb4   :  { %2211 = vmatpush1.bf16.msra.mxu0 %v2210_v53  ;;  %1957 = vmatprep.subr.bf16.mxu1 %v1956_v54  ;;  %v150_v53 = vld [vmem:[#allocation5 + $0x340] sm:$0xff] }
  0xb5   :  { %2213 = vmatprep.subr.bf16.mxu0 %v2212_v58  ;;  %v146_v54 = vld [vmem:[#allocation5 + $0x320] sm:$0xff]  ;;  %v163_v58 = vld [vmem:[#allocation5 + $0x3a8] sm:$0xff]  ;;  %v1978_v61 = vpack.c.bf16 %v150_v53, %v144_v52  ;;  %v2252_v52 = vpack.c.bf16 %v213_v45, %v207_v44  ;;  %v212_v53 = vld [vmem:[#allocation5 + $0x530] sm:$0xff] }
  0xb6   :  { %v2234_v62 = vpack.c.bf16 %v152_v56, %v146_v54  ;;  %v1980_v63 = vpack.c.bf16 %v163_v58, %v157_v57  ;;  %v217_v54 = vld [vmem:[#allocation5 + $0x558] sm:$0xff]  ;;  %v219_v56 = vld [vmem:[#allocation5 + $0x568] sm:$0xff] }
  0xb7   :  { %1959 = vmatpush1.bf16.msra.mxu1 %v1958_v0  ;;  %v156_v0 = vld [vmem:[#allocation5 + $0x370] sm:$0xff]  ;;  %v225_v57 = vld [vmem:[#allocation5 + $0x598] sm:$0xff] }
  0xb8   :  { %2215 = vmatpush1.bf16.msra.mxu0 %v2214_v16  ;;  %1961 = vmatprep.subr.bf16.mxu1 %v1960_v1  ;;  %v162_v16 = vld [vmem:[#allocation5 + $0x3a0] sm:$0xff] }
  0xb9   :  { %2217 = vmatprep.subr.bf16.mxu0 %v2216_v5  ;;  %v158_v1 = vld [vmem:[#allocation5 + $0x380] sm:$0xff]  ;;  %v175_v5 = vld [vmem:[#allocation5 + $0x408] sm:$0xff]  ;;  %v1982_v8 = vpack.c.bf16 %v162_v16, %v156_v0  ;;  %v2256_v0 = vpack.c.bf16 %v225_v57, %v219_v56  ;;  %v224_v16 = vld [vmem:[#allocation5 + $0x590] sm:$0xff] }
  0xba   :  { %v2238_v9 = vpack.c.bf16 %v164_v3, %v158_v1  ;;  %v1984_v10 = vpack.c.bf16 %v175_v5, %v169_v4  ;;  %v229_v1 = vld [vmem:[#allocation5 + $0x5b8] sm:$0xff]  ;;  %v231_v3 = vld [vmem:[#allocation5 + $0x5c8] sm:$0xff] }
  0xbb   :  { %1963 = vmatpush1.bf16.msra.mxu1 %v1962_v11  ;;  %v168_v11 = vld [vmem:[#allocation5 + $0x3d0] sm:$0xff]  ;;  %v237_v4 = vld [vmem:[#allocation5 + $0x5f8] sm:$0xff] }
  0xbc   :  { %2219 = vmatpush1.bf16.msra.mxu0 %v2218_v12  ;;  %1965 = vmatprep.subr.bf16.mxu1 %v1964_v13  ;;  %v174_v12 = vld [vmem:[#allocation5 + $0x400] sm:$0xff] }
  0xbd   :  { %2221 = vmatprep.subr.bf16.mxu0 %v2220_v18  ;;  %v170_v13 = vld [vmem:[#allocation5 + $0x3e0] sm:$0xff]  ;;  %v187_v18 = vld [vmem:[#allocation5 + $0x468] sm:$0xff]  ;;  %v1986_v21 = vpack.c.bf16 %v174_v12, %v168_v11  ;;  %v2260_v11 = vpack.c.bf16 %v237_v4, %v231_v3  ;;  %v236_v12 = vld [vmem:[#allocation5 + $0x5f0] sm:$0xff] }
  0xbe   :  { %v2242_v22 = vpack.c.bf16 %v176_v15, %v170_v13  ;;  %v1988_v23 = vpack.c.bf16 %v187_v18, %v181_v17  ;;  %v241_v13 = vld [vmem:[#allocation5 + $0x618] sm:$0xff]  ;;  %v243_v15 = vld [vmem:[#allocation5 + $0x628] sm:$0xff] }
  0xbf   :  { %1967 = vmatpush1.bf16.msra.mxu1 %v1966_v24  ;;  %v180_v24 = vld [vmem:[#allocation5 + $0x430] sm:$0xff]  ;;  %v249_v17 = vld [vmem:[#allocation5 + $0x658] sm:$0xff] }
  0xc0   :  { %2223 = vmatpush1.bf16.msra.mxu0 %v2222_v25  ;;  %1969 = vmatprep.subr.bf16.mxu1 %v1968_v27  ;;  %v186_v25 = vld [vmem:[#allocation5 + $0x460] sm:$0xff] }
  0xc1   :  { %2225 = vmatprep.subr.bf16.mxu0 %v2224_v31  ;;  %v182_v27 = vld [vmem:[#allocation5 + $0x440] sm:$0xff]  ;;  %v199_v31 = vld [vmem:[#allocation5 + $0x4c8] sm:$0xff]  ;;  %v1990_v34 = vpack.c.bf16 %v186_v25, %v180_v24  ;;  %v2264_v24 = vpack.c.bf16 %v249_v17, %v243_v15  ;;  %v248_v25 = vld [vmem:[#allocation5 + $0x650] sm:$0xff] }
  0xc2   :  { %v2246_v35 = vpack.c.bf16 %v188_v29, %v182_v27  ;;  %v1992_v36 = vpack.c.bf16 %v199_v31, %v193_v30  ;;  %v253_v27 = vld [vmem:[#allocation5 + $0x678] sm:$0xff]  ;;  %v255_v29 = vld [vmem:[#allocation5 + $0x688] sm:$0xff] }
  0xc3   :  { %1971 = vmatpush1.bf16.msra.mxu1 %v1970_v37  ;;  %v192_v37 = vld [vmem:[#allocation5 + $0x490] sm:$0xff]  ;;  %v261_v30 = vld [vmem:[#allocation5 + $0x6b8] sm:$0xff] }
  0xc4   :  { %2227 = vmatpush1.bf16.msra.mxu0 %v2226_v38  ;;  %1973 = vmatprep.subr.bf16.mxu1 %v1972_v39  ;;  %v198_v38 = vld [vmem:[#allocation5 + $0x4c0] sm:$0xff] }
  0xc5   :  { %2229 = vmatprep.subr.bf16.mxu0 %v2228_v43  ;;  %v194_v39 = vld [vmem:[#allocation5 + $0x4a0] sm:$0xff]  ;;  %v211_v43 = vld [vmem:[#allocation5 + $0x528] sm:$0xff]  ;;  %v1994_v46 = vpack.c.bf16 %v198_v38, %v192_v37  ;;  %v2268_v37 = vpack.c.bf16 %v261_v30, %v255_v29  ;;  %v260_v38 = vld [vmem:[#allocation5 + $0x6b0] sm:$0xff] }
  0xc6   :  { %v2250_v47 = vpack.c.bf16 %v200_v41, %v194_v39  ;;  %v1996_v48 = vpack.c.bf16 %v211_v43, %v205_v42  ;;  %v265_v39 = vld [vmem:[#allocation5 + $0x6d8] sm:$0xff]  ;;  %v2479_v41 = vld [vmem:[#allocation2] sm:$0xff]  ;;  %v267_v42 = vld [vmem:[#allocation5 + $0x6e8] sm:$0xff] }
  0xc7   :  { %1975 = vmatpush1.bf16.msra.mxu1 %v1974_v49  ;;  %v204_v49 = vld [vmem:[#allocation5 + $0x4f0] sm:$0xff]  ;;  %v273_v43 = vld [vmem:[#allocation5 + $0x718] sm:$0xff] }
  0xc8   :  { %2231 = vmatpush1.bf16.msra.mxu0 %v2230_v50  ;;  %1977 = vmatprep.subr.bf16.mxu1 %v1976_v51  ;;  %v210_v50 = vld [vmem:[#allocation5 + $0x520] sm:$0xff] }
  0xc9   :  { %2233 = vmatprep.subr.bf16.mxu0 %v2232_v55  ;;  %v206_v51 = vld [vmem:[#allocation5 + $0x500] sm:$0xff]  ;;  %v223_v55 = vld [vmem:[#allocation5 + $0x588] sm:$0xff]  ;;  %v1998_v58 = vpack.c.bf16 %v210_v50, %v204_v49  ;;  %v2272_v50 = vpack.c.bf16 %v273_v43, %v267_v42  ;;  %v324_v43 = vld [vmem:[#allocation5 + $0x8b0] sm:$0xff] }
  0xca   :  { %v2254_v59 = vpack.c.bf16 %v212_v53, %v206_v51  ;;  %v2000_v60 = vpack.c.bf16 %v223_v55, %v217_v54  ;;  %v266_v49 = vld [vmem:[#allocation5 + $0x6e0] sm:$0xff]  ;;  %v272_v51 = vld [vmem:[#allocation5 + $0x710] sm:$0xff]  ;;  %v283_v53 = vld [vmem:[#allocation5 + $0x768] sm:$0xff] }
  0xcb   :  { %1979 = vmatpush1.bf16.msra.mxu1 %v1978_v61  ;;  %v216_v61 = vld [vmem:[#allocation5 + $0x550] sm:$0xff]  ;;  %v279_v54 = vld [vmem:[#allocation5 + $0x748] sm:$0xff]  ;;  %v285_v55 = vld [vmem:[#allocation5 + $0x778] sm:$0xff]  ;;  %v2274_v57 = vpack.c.bf16 %v272_v51, %v266_v49 }
  0xcc   :  { %2235 = vmatpush1.bf16.msra.mxu0 %v2234_v62  ;;  %1981 = vmatprep.subr.bf16.mxu1 %v1980_v63  ;;  %v222_v62 = vld [vmem:[#allocation5 + $0x580] sm:$0xff]  ;;  %v343_v49 = vld [vmem:[#allocation5 + $0x948] sm:$0xff]  ;;  %v345_v51 = vld [vmem:[#allocation5 + $0x958] sm:$0xff] }
  0xcd   :  { %2237 = vmatprep.subr.bf16.mxu0 %v2236_v2  ;;  %v218_v63 = vld [vmem:[#allocation5 + $0x560] sm:$0xff]  ;;  %v235_v2 = vld [vmem:[#allocation5 + $0x5e8] sm:$0xff]  ;;  %v2002_v5 = vpack.c.bf16 %v222_v62, %v216_v61  ;;  %v2276_v62 = vpack.c.bf16 %v285_v55, %v279_v54  ;;  %v336_v55 = vld [vmem:[#allocation5 + $0x910] sm:$0xff] }
  0xce   :  { %v2258_v6 = vpack.c.bf16 %v224_v16, %v218_v63  ;;  %v2004_v7 = vpack.c.bf16 %v235_v2, %v229_v1  ;;  %v278_v61 = vld [vmem:[#allocation5 + $0x740] sm:$0xff]  ;;  %v284_v63 = vld [vmem:[#allocation5 + $0x770] sm:$0xff]  ;;  %v295_v16 = vld [vmem:[#allocation5 + $0x7c8] sm:$0xff] }
  0xcf   :  { %1983 = vmatpush1.bf16.msra.mxu1 %v1982_v8  ;;  %v228_v8 = vld [vmem:[#allocation5 + $0x5b0] sm:$0xff]  ;;  %v291_v1 = vld [vmem:[#allocation5 + $0x7a8] sm:$0xff]  ;;  %v297_v2 = vld [vmem:[#allocation5 + $0x7d8] sm:$0xff] }
  0xd0   :  { %2239 = vmatpush1.bf16.msra.mxu0 %v2238_v9  ;;  %1985 = vmatprep.subr.bf16.mxu1 %v1984_v10  ;;  %v234_v9 = vld [vmem:[#allocation5 + $0x5e0] sm:$0xff] }
  0xd1   :  { %2241 = vmatprep.subr.bf16.mxu0 %v2240_v14  ;;  %v230_v10 = vld [vmem:[#allocation5 + $0x5c0] sm:$0xff]  ;;  %v247_v14 = vld [vmem:[#allocation5 + $0x648] sm:$0xff]  ;;  %v2006_v18 = vpack.c.bf16 %v234_v9, %v228_v8  ;;  %v2280_v8 = vpack.c.bf16 %v297_v2, %v291_v1  ;;  %v296_v9 = vld [vmem:[#allocation5 + $0x7d0] sm:$0xff] }
  0xd2   :  { %v2262_v19 = vpack.c.bf16 %v236_v12, %v230_v10  ;;  %v2008_v20 = vpack.c.bf16 %v247_v14, %v241_v13  ;;  %v301_v10 = vld [vmem:[#allocation5 + $0x7f8] sm:$0xff]  ;;  %v303_v12 = vld [vmem:[#allocation5 + $0x808] sm:$0xff]  ;;  %v348_v2 = vld [vmem:[#allocation5 + $0x970] sm:$0xff] }
  0xd3   :  { %1987 = vmatpush1.bf16.msra.mxu1 %v1986_v21  ;;  %v240_v21 = vld [vmem:[#allocation5 + $0x610] sm:$0xff]  ;;  %v309_v13 = vld [vmem:[#allocation5 + $0x838] sm:$0xff] }
  0xd4   :  { %2243 = vmatpush1.bf16.msra.mxu0 %v2242_v22  ;;  %1989 = vmatprep.subr.bf16.mxu1 %v1988_v23  ;;  %v246_v22 = vld [vmem:[#allocation5 + $0x640] sm:$0xff] }
  0xd5   :  { %2245 = vmatprep.subr.bf16.mxu0 %v2244_v28  ;;  %v242_v23 = vld [vmem:[#allocation5 + $0x620] sm:$0xff]  ;;  %v259_v28 = vld [vmem:[#allocation5 + $0x6a8] sm:$0xff]  ;;  %v2010_v31 = vpack.c.bf16 %v246_v22, %v240_v21  ;;  %v2284_v21 = vpack.c.bf16 %v309_v13, %v303_v12  ;;  %v308_v22 = vld [vmem:[#allocation5 + $0x830] sm:$0xff] }
  0xd6   :  { %v2266_v32 = vpack.c.bf16 %v248_v25, %v242_v23  ;;  %v2012_v33 = vpack.c.bf16 %v259_v28, %v253_v27  ;;  %v313_v23 = vld [vmem:[#allocation5 + $0x858] sm:$0xff]  ;;  %v315_v25 = vld [vmem:[#allocation5 + $0x868] sm:$0xff]  ;;  %v360_v13 = vld [vmem:[#allocation5 + $0x9d0] sm:$0xff] }
  0xd7   :  { %1991 = vmatpush1.bf16.msra.mxu1 %v1990_v34  ;;  %v252_v34 = vld [vmem:[#allocation5 + $0x670] sm:$0xff]  ;;  %v321_v27 = vld [vmem:[#allocation5 + $0x898] sm:$0xff] }
  0xd8   :  { %2247 = vmatpush1.bf16.msra.mxu0 %v2246_v35  ;;  %1993 = vmatprep.subr.bf16.mxu1 %v1992_v36  ;;  %v258_v35 = vld [vmem:[#allocation5 + $0x6a0] sm:$0xff] }
  0xd9   :  { %2249 = vmatprep.subr.bf16.mxu0 %v2248_v40  ;;  %v254_v36 = vld [vmem:[#allocation5 + $0x680] sm:$0xff]  ;;  %v271_v40 = vld [vmem:[#allocation5 + $0x708] sm:$0xff]  ;;  %v2014_v44 = vpack.c.bf16 %v258_v35, %v252_v34  ;;  %v2288_v34 = vpack.c.bf16 %v321_v27, %v315_v25  ;;  %v320_v35 = vld [vmem:[#allocation5 + $0x890] sm:$0xff] }
  0xda   :  { %v2270_v45 = vpack.c.bf16 %v260_v38, %v254_v36  ;;  %v325_v36 = vld [vmem:[#allocation5 + $0x8b8] sm:$0xff]  ;;  %v327_v38 = vld [vmem:[#allocation5 + $0x8c8] sm:$0xff]  ;;  %v372_v27 = vld [vmem:[#allocation5 + $0xa30] sm:$0xff] }
  0xdb   :  { %1995 = vmatpush1.bf16.msra.mxu1 %v1994_v46  ;;  %v2016_v46 = vpack.c.bf16 %v271_v40, %v265_v39  ;;  %v333_v39 = vld [vmem:[#allocation5 + $0x8f8] sm:$0xff] }
  0xdc   :  { %2251 = vmatpush1.bf16.msra.mxu0 %v2250_v47  ;;  %1997 = vmatprep.subr.bf16.mxu1 %v1996_v48  ;;  %v264_v47 = vld [vmem:[#allocation5 + $0x6d0] sm:$0xff]  ;;  %v270_v48 = vld [vmem:[#allocation5 + $0x700] sm:$0xff] }
  0xdd   :  { %2253 = vmatprep.subr.bf16.mxu0 %v2252_v52  ;;  %v277_v52 = vld [vmem:[#allocation5 + $0x738] sm:$0xff]  ;;  %v2018_v56 = vpack.c.bf16 %v270_v48, %v264_v47  ;;  %v332_v47 = vld [vmem:[#allocation5 + $0x8f0] sm:$0xff] }
  0xde   :  { %v337_v48 = vld [vmem:[#allocation5 + $0x918] sm:$0xff] }
  0xdf   :  { %1999 = vmatpush1.bf16.msra.mxu1 %v1998_v58  ;;  %v2020_v58 = vpack.c.bf16 %v283_v53, %v277_v52  ;;  %v2040_v54 = vpack.c.bf16 %v343_v49, %v337_v48 }
  0xe0   :  { %2255 = vmatpush1.bf16.msra.mxu0 %v2254_v59  ;;  %2001 = vmatprep.subr.bf16.mxu1 %v2000_v60  ;;  %v276_v59 = vld [vmem:[#allocation5 + $0x730] sm:$0xff]  ;;  %v282_v60 = vld [vmem:[#allocation5 + $0x760] sm:$0xff] }
  0xe1   :  { %2257 = vmatprep.subr.bf16.mxu0 %v2256_v0  ;;  %v289_v0 = vld [vmem:[#allocation5 + $0x798] sm:$0xff]  ;;  %v2022_v3 = vpack.c.bf16 %v282_v60, %v276_v59  ;;  %v344_v59 = vld [vmem:[#allocation5 + $0x950] sm:$0xff] }
  0xe2   :  { %v2024_v4 = vpack.c.bf16 %v295_v16, %v289_v0  ;;  %v349_v60 = vld [vmem:[#allocation5 + $0x978] sm:$0xff] }
  0xe3   :  { %2003 = vmatpush1.bf16.msra.mxu1 %v2002_v5  ;;  %v288_v5 = vld [vmem:[#allocation5 + $0x790] sm:$0xff] }
  0xe4   :  { %2259 = vmatpush1.bf16.msra.mxu0 %v2258_v6  ;;  %2005 = vmatprep.subr.bf16.mxu1 %v2004_v7  ;;  %v294_v6 = vld [vmem:[#allocation5 + $0x7c0] sm:$0xff] }
  0xe5   :  { %2261 = vmatprep.subr.bf16.mxu0 %v2260_v11  ;;  %v290_v7 = vld [vmem:[#allocation5 + $0x7a0] sm:$0xff]  ;;  %v307_v11 = vld [vmem:[#allocation5 + $0x828] sm:$0xff]  ;;  %v2026_v14 = vpack.c.bf16 %v294_v6, %v288_v5  ;;  %v356_v5 = vld [vmem:[#allocation5 + $0x9b0] sm:$0xff] }
  0xe6   :  { %v2282_v15 = vpack.c.bf16 %v296_v9, %v290_v7  ;;  %v2028_v17 = vpack.c.bf16 %v307_v11, %v301_v10  ;;  %v361_v6 = vld [vmem:[#allocation5 + $0x9d8] sm:$0xff]  ;;  %v367_v7 = vld [vmem:[#allocation5 + $0xa08] sm:$0xff] }
  0xe7   :  { %2007 = vmatpush1.bf16.msra.mxu1 %v2006_v18  ;;  %v300_v18 = vld [vmem:[#allocation5 + $0x7f0] sm:$0xff]  ;;  %v369_v9 = vld [vmem:[#allocation5 + $0xa18] sm:$0xff]  ;;  %v2048_v12 = vpack.c.bf16 %v367_v7, %v361_v6 }
  0xe8   :  { %2263 = vmatpush1.bf16.msra.mxu0 %v2262_v19  ;;  %2009 = vmatprep.subr.bf16.mxu1 %v2008_v20  ;;  %v306_v19 = vld [vmem:[#allocation5 + $0x820] sm:$0xff] }
  0xe9   :  { %2265 = vmatprep.subr.bf16.mxu0 %v2264_v24  ;;  %v302_v20 = vld [vmem:[#allocation5 + $0x800] sm:$0xff]  ;;  %v319_v24 = vld [vmem:[#allocation5 + $0x888] sm:$0xff]  ;;  %v2030_v28 = vpack.c.bf16 %v306_v19, %v300_v18  ;;  %v368_v18 = vld [vmem:[#allocation5 + $0xa10] sm:$0xff] }
  0xea   :  { %1163 = vmatmul.mubr.f32.vlgmr.msra.gmra.mrb[2].mxu1 %v2479_v41  ;;  %v2286_v29 = vpack.c.bf16 %v308_v22, %v302_v20  ;;  %v2032_v30 = vpack.c.bf16 %v319_v24, %v313_v23  ;;  %v373_v19 = vld [vmem:[#allocation5 + $0xa38] sm:$0xff]  ;;  %v379_v20 = vld [vmem:[#allocation5 + $0xa68] sm:$0xff] }
  0xeb   :  { %2011 = vmatpush1.bf16.msra.mxu1 %v2010_v31  ;;  %1447 = vmatmul.mubr.f32.vlgmr.msra.gmra.mrb[2].mxu0 %v2479_v41  ;;  %v312_v31 = vld [vmem:[#allocation5 + $0x850] sm:$0xff]  ;;  %v381_v22 = vld [vmem:[#allocation5 + $0xa78] sm:$0xff]  ;;  %v2052_v25 = vpack.c.bf16 %v379_v20, %v373_v19 }
  0xec   :  { %2267 = vmatpush1.bf16.msra.mxu0 %v2266_v32  ;;  %2013 = vmatprep.subr.bf16.mxu1 %v2012_v33  ;;  %v318_v32 = vld [vmem:[#allocation5 + $0x880] sm:$0xff] }
  0xed   :  { %2269 = vmatprep.subr.bf16.mxu0 %v2268_v37  ;;  %1233 = vmatprep.mubr.f32.mxu1 %v2611_v26  ;;  %v314_v33 = vld [vmem:[#allocation5 + $0x860] sm:$0xff]  ;;  %v331_v37 = vld [vmem:[#allocation5 + $0x8e8] sm:$0xff]  ;;  %v2034_v40 = vpack.c.bf16 %v318_v32, %v312_v31  ;;  %v380_v31 = vld [vmem:[#allocation5 + $0xa70] sm:$0xff] }
  0xee   :  { %1517 = vmatprep.mubr.f32.mxu0 %v2611_v26  ;;  %v2278_v26 = vpack.c.bf16 %v284_v63, %v278_v61  ;;  %v2290_v41 = vpack.c.bf16 %v320_v35, %v314_v33  ;;  %v2036_v42 = vpack.c.bf16 %v331_v37, %v325_v36  ;;  %v355_v61 = vld [vmem:[#allocation5 + $0x9a8] sm:$0xff]  ;;  %v357_v63 = vld [vmem:[#allocation5 + $0x9b8] sm:$0xff] }
  0xef   :  { %2015 = vmatpush1.bf16.msra.mxu1 %v2014_v44  ;;  %v330_v44 = vld [vmem:[#allocation5 + $0x8e0] sm:$0xff]  ;;  %v2044_v1 = vpack.c.bf16 %v355_v61, %v349_v60  ;;  %v385_v32 = vld [vmem:[#allocation5 + $0xa98] sm:$0xff]  ;;  %v391_v33 = vld [vmem:[#allocation5 + $0xac8] sm:$0xff] }
  0xf0   :  { %2271 = vmatpush1.bf16.msra.mxu0 %v2270_v45  ;;  %2017 = vmatprep.subr.bf16.mxu1 %v2016_v46  ;;  %v326_v45 = vld [vmem:[#allocation5 + $0x8c0] sm:$0xff]  ;;  %v2292_v46 = vpack.c.bf16 %v333_v39, %v327_v38  ;;  %v2038_v52 = vpack.c.bf16 %v330_v44, %v324_v43  ;;  %v393_v35 = vld [vmem:[#allocation5 + $0xad8] sm:$0xff]  ;;  %v2056_v38 = vpack.c.bf16 %v391_v33, %v385_v32  ;;  %v384_v39 = vld [vmem:[#allocation5 + $0xa90] sm:$0xff] }
  0xf1   :  { %2273 = vmatprep.subr.bf16.mxu0 %v2272_v50  ;;  %v339_v50 = vld [vmem:[#allocation5 + $0x928] sm:$0xff]  ;;  %v2294_v53 = vpack.c.bf16 %v332_v47, %v326_v45  ;;  %v392_v43 = vld [vmem:[#allocation5 + $0xad0] sm:$0xff]  ;;  %v397_v44 = vld [vmem:[#allocation5 + $0xaf8] sm:$0xff] }
  0xf2   :  { %v403_v45 = vld [vmem:[#allocation5 + $0xb28] sm:$0xff]  ;;  %v405_v47 = vld [vmem:[#allocation5 + $0xb38] sm:$0xff] }
  0xf3   :  { %2019 = vmatpush1.bf16.msra.mxu1 %v2018_v56  ;;  %v342_v56 = vld [vmem:[#allocation5 + $0x940] sm:$0xff] }
  0xf4   :  { %2275 = vmatpush1.bf16.msra.mxu0 %v2274_v57  ;;  %2021 = vmatprep.subr.bf16.mxu1 %v2020_v58  ;;  %v338_v57 = vld [vmem:[#allocation5 + $0x920] sm:$0xff]  ;;  %v2296_v58 = vpack.c.bf16 %v345_v51, %v339_v50  ;;  %v2042_v0 = vpack.c.bf16 %v342_v56, %v336_v55  ;;  %v2060_v50 = vpack.c.bf16 %v403_v45, %v397_v44  ;;  %v396_v51 = vld [vmem:[#allocation5 + $0xaf0] sm:$0xff]  ;;  %v409_v56 = vld [vmem:[#allocation5 + $0xb58] sm:$0xff] }
  0xf5   :  { %2277 = vmatprep.subr.bf16.mxu0 %v2276_v62  ;;  %v351_v62 = vld [vmem:[#allocation5 + $0x988] sm:$0xff]  ;;  %v2298_v16 = vpack.c.bf16 %v344_v59, %v338_v57  ;;  %v404_v55 = vld [vmem:[#allocation5 + $0xb30] sm:$0xff]  ;;  %v417_v59 = vld [vmem:[#allocation5 + $0xb98] sm:$0xff] }
  0xf6   :  { %v415_v57 = vld [vmem:[#allocation5 + $0xb88] sm:$0xff]  ;;  %v465_v44 = vld [vmem:[#allocation5 + $0xd18] sm:$0xff] }
  0xf7   :  { %2023 = vmatpush1.bf16.msra.mxu1 %v2022_v3  ;;  %v354_v3 = vld [vmem:[#allocation5 + $0x9a0] sm:$0xff] }
  0xf8   :  { %2279 = vmatpush1.bf16.msra.mxu0 %v2278_v26  ;;  %2025 = vmatprep.subr.bf16.mxu1 %v2024_v4  ;;  %v350_v26 = vld [vmem:[#allocation5 + $0x980] sm:$0xff]  ;;  %v2300_v4 = vpack.c.bf16 %v357_v63, %v351_v62  ;;  %v2046_v10 = vpack.c.bf16 %v354_v3, %v348_v2  ;;  %v2064_v62 = vpack.c.bf16 %v415_v57, %v409_v56  ;;  %v408_v63 = vld [vmem:[#allocation5 + $0xb50] sm:$0xff]  ;;  %v421_v3 = vld [vmem:[#allocation5 + $0xbb8] sm:$0xff] }
  0xf9   :  { %2281 = vmatprep.subr.bf16.mxu0 %v2280_v8  ;;  %v363_v8 = vld [vmem:[#allocation5 + $0x9e8] sm:$0xff]  ;;  %v2302_v11 = vpack.c.bf16 %v356_v5, %v350_v26  ;;  %v416_v2 = vld [vmem:[#allocation5 + $0xb90] sm:$0xff]  ;;  %v429_v5 = vld [vmem:[#allocation5 + $0xbf8] sm:$0xff] }
  0xfa   :  { %v427_v26 = vld [vmem:[#allocation5 + $0xbe8] sm:$0xff]  ;;  %v477_v57 = vld [vmem:[#allocation5 + $0xd78] sm:$0xff] }
  0xfb   :  { %2027 = vmatpush1.bf16.msra.mxu1 %v2026_v14  ;;  %v366_v14 = vld [vmem:[#allocation5 + $0xa00] sm:$0xff]  ;;  %v471_v56 = vld [vmem:[#allocation5 + $0xd48] sm:$0xff] }
  0xfc   :  { %2283 = vmatpush1.bf16.msra.mxu0 %v2282_v15  ;;  %2029 = vmatprep.subr.bf16.mxu1 %v2028_v17  ;;  %v362_v15 = vld [vmem:[#allocation5 + $0x9e0] sm:$0xff]  ;;  %v2304_v17 = vpack.c.bf16 %v369_v9, %v363_v8  ;;  %v2050_v23 = vpack.c.bf16 %v366_v14, %v360_v13  ;;  %v2068_v8 = vpack.c.bf16 %v427_v26, %v421_v3  ;;  %v420_v9 = vld [vmem:[#allocation5 + $0xbb0] sm:$0xff]  ;;  %v433_v14 = vld [vmem:[#allocation5 + $0xc18] sm:$0xff] }
  0xfd   :  { %2285 = vmatprep.subr.bf16.mxu0 %v2284_v21  ;;  %v375_v21 = vld [vmem:[#allocation5 + $0xa48] sm:$0xff]  ;;  %v2306_v24 = vpack.c.bf16 %v368_v18, %v362_v15  ;;  %v428_v13 = vld [vmem:[#allocation5 + $0xbf0] sm:$0xff]  ;;  %v441_v18 = vld [vmem:[#allocation5 + $0xc58] sm:$0xff] }
  0xfe   :  { %v439_v15 = vld [vmem:[#allocation5 + $0xc48] sm:$0xff]  ;;  %v489_v26 = vld [vmem:[#allocation5 + $0xdd8] sm:$0xff] }
  0xff   :  { %2031 = vmatpush1.bf16.msra.mxu1 %v2030_v28  ;;  %v378_v28 = vld [vmem:[#allocation5 + $0xa60] sm:$0xff]  ;;  %v483_v3 = vld [vmem:[#allocation5 + $0xda8] sm:$0xff] }
 0x100   :  { %2287 = vmatpush1.bf16.msra.mxu0 %v2286_v29  ;;  %2033 = vmatprep.subr.bf16.mxu1 %v2032_v30  ;;  %v374_v29 = vld [vmem:[#allocation5 + $0xa40] sm:$0xff]  ;;  %v2308_v30 = vpack.c.bf16 %v381_v22, %v375_v21  ;;  %v2054_v36 = vpack.c.bf16 %v378_v28, %v372_v27  ;;  %v2072_v21 = vpack.c.bf16 %v439_v15, %v433_v14  ;;  %v432_v22 = vld [vmem:[#allocation5 + $0xc10] sm:$0xff]  ;;  %v445_v28 = vld [vmem:[#allocation5 + $0xc78] sm:$0xff] }
 0x101   :  { %2289 = vmatprep.subr.bf16.mxu0 %v2288_v34  ;;  %v387_v34 = vld [vmem:[#allocation5 + $0xaa8] sm:$0xff]  ;;  %v2310_v37 = vpack.c.bf16 %v380_v31, %v374_v29  ;;  %v440_v27 = vld [vmem:[#allocation5 + $0xc50] sm:$0xff]  ;;  %v453_v31 = vld [vmem:[#allocation5 + $0xcb8] sm:$0xff] }
 0x102   :  { %v451_v29 = vld [vmem:[#allocation5 + $0xca8] sm:$0xff]  ;;  %v501_v15 = vld [vmem:[#allocation5 + $0xe38] sm:$0xff] }
 0x103   :  { %2035 = vmatpush1.bf16.msra.mxu1 %v2034_v40  ;;  %v390_v40 = vld [vmem:[#allocation5 + $0xac0] sm:$0xff]  ;;  %v495_v14 = vld [vmem:[#allocation5 + $0xe08] sm:$0xff] }
 0x104   :  { %2291 = vmatpush1.bf16.msra.mxu0 %v2290_v41  ;;  %2037 = vmatprep.subr.bf16.mxu1 %v2036_v42  ;;  %v386_v41 = vld [vmem:[#allocation5 + $0xaa0] sm:$0xff]  ;;  %v2312_v42 = vpack.c.bf16 %v393_v35, %v387_v34  ;;  %v2058_v48 = vpack.c.bf16 %v390_v40, %v384_v39  ;;  %v2076_v34 = vpack.c.bf16 %v451_v29, %v445_v28  ;;  %v444_v35 = vld [vmem:[#allocation5 + $0xc70] sm:$0xff]  ;;  %v457_v40 = vld [vmem:[#allocation5 + $0xcd8] sm:$0xff] }
 0x105   :  { %2293 = vmatprep.subr.bf16.mxu0 %v2292_v46  ;;  %v399_v46 = vld [vmem:[#allocation5 + $0xb08] sm:$0xff]  ;;  %v2314_v49 = vpack.c.bf16 %v392_v43, %v386_v41  ;;  %v452_v39 = vld [vmem:[#allocation5 + $0xcb0] sm:$0xff]  ;;  %v513_v29 = vld [vmem:[#allocation5 + $0xe98] sm:$0xff] }
 0x106   :  { %v463_v41 = vld [vmem:[#allocation5 + $0xd08] sm:$0xff] }
 0x107   :  { %2039 = vmatpush1.bf16.msra.mxu1 %v2038_v52  ;;  %v402_v52 = vld [vmem:[#allocation5 + $0xb20] sm:$0xff]  ;;  %v459_v43 = vld [vmem:[#allocation5 + $0xce8] sm:$0xff] }
 0x108   :  { %2295 = vmatpush1.bf16.msra.mxu0 %v2294_v53  ;;  %2041 = vmatprep.subr.bf16.mxu1 %v2040_v54  ;;  %v398_v53 = vld [vmem:[#allocation5 + $0xb00] sm:$0xff]  ;;  %v2316_v54 = vpack.c.bf16 %v405_v47, %v399_v46  ;;  %v2062_v60 = vpack.c.bf16 %v402_v52, %v396_v51  ;;  %v2080_v47 = vpack.c.bf16 %v463_v41, %v457_v40  ;;  %v464_v52 = vld [vmem:[#allocation5 + $0xd10] sm:$0xff]  ;;  %v507_v28 = vld [vmem:[#allocation5 + $0xe68] sm:$0xff] }
 0x109   :  { %2297 = vmatprep.subr.bf16.mxu0 %v2296_v58  ;;  %v411_v58 = vld [vmem:[#allocation5 + $0xb68] sm:$0xff]  ;;  %v2318_v61 = vpack.c.bf16 %v404_v55, %v398_v53  ;;  %v2336_v51 = vpack.c.bf16 %v465_v44, %v459_v43  ;;  %v469_v53 = vld [vmem:[#allocation5 + $0xd38] sm:$0xff] }
 0x10a   :  { %v2481_v55 = vld [vmem:[#allocation2 + $0x28] sm:$0xff]  ;;  %v525_v41 = vld [vmem:[#allocation5 + $0xef8] sm:$0xff] }
 0x10b   :  { %2043 = vmatpush1.bf16.msra.mxu1 %v2042_v0  ;;  %v414_v0 = vld [vmem:[#allocation5 + $0xb80] sm:$0xff]  ;;  %v519_v40 = vld [vmem:[#allocation5 + $0xec8] sm:$0xff] }
 0x10c   :  { %2299 = vmatpush1.bf16.msra.mxu0 %v2298_v16  ;;  %2045 = vmatprep.subr.bf16.mxu1 %v2044_v1  ;;  %v410_v16 = vld [vmem:[#allocation5 + $0xb60] sm:$0xff]  ;;  %v2320_v1 = vpack.c.bf16 %v417_v59, %v411_v58  ;;  %v2066_v6 = vpack.c.bf16 %v414_v0, %v408_v63  ;;  %v2340_v0 = vpack.c.bf16 %v477_v57, %v471_v56  ;;  %v528_v57 = vld [vmem:[#allocation5 + $0xf10] sm:$0xff] }
 0x10d   :  { %2301 = vmatprep.subr.bf16.mxu0 %v2300_v4  ;;  %v423_v4 = vld [vmem:[#allocation5 + $0xbc8] sm:$0xff]  ;;  %v2322_v7 = vpack.c.bf16 %v416_v2, %v410_v16  ;;  %v470_v63 = vld [vmem:[#allocation5 + $0xd40] sm:$0xff]  ;;  %v476_v16 = vld [vmem:[#allocation5 + $0xd70] sm:$0xff] }
 0x10e   :  { %v487_v2 = vld [vmem:[#allocation5 + $0xdc8] sm:$0xff] }
 0x10f   :  { %2047 = vmatpush1.bf16.msra.mxu1 %v2046_v10  ;;  %v426_v10 = vld [vmem:[#allocation5 + $0xbe0] sm:$0xff] }
 0x110   :  { %2303 = vmatpush1.bf16.msra.mxu0 %v2302_v11  ;;  %2049 = vmatprep.subr.bf16.mxu1 %v2048_v12  ;;  %v422_v11 = vld [vmem:[#allocation5 + $0xbc0] sm:$0xff]  ;;  %v2324_v12 = vpack.c.bf16 %v429_v5, %v423_v4  ;;  %v2070_v19 = vpack.c.bf16 %v426_v10, %v420_v9  ;;  %v2342_v5 = vpack.c.bf16 %v476_v16, %v470_v63  ;;  %v547_v63 = vld [vmem:[#allocation5 + $0xfa8] sm:$0xff]  ;;  %v549_v16 = vld [vmem:[#allocation5 + $0xfb8] sm:$0xff] }
 0x111   :  { %2305 = vmatprep.subr.bf16.mxu0 %v2304_v17  ;;  %v435_v17 = vld [vmem:[#allocation5 + $0xc28] sm:$0xff]  ;;  %v2326_v20 = vpack.c.bf16 %v428_v13, %v422_v11  ;;  %v482_v9 = vld [vmem:[#allocation5 + $0xda0] sm:$0xff]  ;;  %v2344_v10 = vpack.c.bf16 %v489_v26, %v483_v3  ;;  %v488_v11 = vld [vmem:[#allocation5 + $0xdd0] sm:$0xff] }
 0x112   :  { %v499_v13 = vld [vmem:[#allocation5 + $0xe28] sm:$0xff]  ;;  %v540_v26 = vld [vmem:[#allocation5 + $0xf70] sm:$0xff] }
 0x113   :  { %2051 = vmatpush1.bf16.msra.mxu1 %v2050_v23  ;;  %v438_v23 = vld [vmem:[#allocation5 + $0xc40] sm:$0xff] }
 0x114   :  { %2307 = vmatpush1.bf16.msra.mxu0 %v2306_v24  ;;  %2053 = vmatprep.subr.bf16.mxu1 %v2052_v25  ;;  %v434_v24 = vld [vmem:[#allocation5 + $0xc20] sm:$0xff]  ;;  %v2328_v25 = vpack.c.bf16 %v441_v18, %v435_v17  ;;  %v2074_v32 = vpack.c.bf16 %v438_v23, %v432_v22  ;;  %v2346_v18 = vpack.c.bf16 %v488_v11, %v482_v9  ;;  %v559_v9 = vld [vmem:[#allocation5 + $0x1008] sm:$0xff]  ;;  %v561_v11 = vld [vmem:[#allocation5 + $0x1018] sm:$0xff] }
 0x115   :  { %2309 = vmatprep.subr.bf16.mxu0 %v2308_v30  ;;  %v447_v30 = vld [vmem:[#allocation5 + $0xc88] sm:$0xff]  ;;  %v2330_v33 = vpack.c.bf16 %v440_v27, %v434_v24  ;;  %v494_v22 = vld [vmem:[#allocation5 + $0xe00] sm:$0xff]  ;;  %v2348_v23 = vpack.c.bf16 %v501_v15, %v495_v14  ;;  %v500_v24 = vld [vmem:[#allocation5 + $0xe30] sm:$0xff] }
 0x116   :  { %v511_v27 = vld [vmem:[#allocation5 + $0xe88] sm:$0xff]  ;;  %v552_v15 = vld [vmem:[#allocation5 + $0xfd0] sm:$0xff] }
 0x117   :  { %2055 = vmatpush1.bf16.msra.mxu1 %v2054_v36  ;;  %v450_v36 = vld [vmem:[#allocation5 + $0xca0] sm:$0xff] }
 0x118   :  { %2311 = vmatpush1.bf16.msra.mxu0 %v2310_v37  ;;  %2057 = vmatprep.subr.bf16.mxu1 %v2056_v38  ;;  %v446_v37 = vld [vmem:[#allocation5 + $0xc80] sm:$0xff]  ;;  %v2332_v38 = vpack.c.bf16 %v453_v31, %v447_v30  ;;  %v2078_v45 = vpack.c.bf16 %v450_v36, %v444_v35  ;;  %v2350_v31 = vpack.c.bf16 %v500_v24, %v494_v22  ;;  %v571_v22 = vld [vmem:[#allocation5 + $0x1068] sm:$0xff]  ;;  %v573_v24 = vld [vmem:[#allocation5 + $0x1078] sm:$0xff] }
 0x119   :  { %2313 = vmatprep.subr.bf16.mxu0 %v2312_v42  ;;  %v2480_v42 = vld [vmem:[#allocation2 + $0x10] sm:$0xff]  ;;  %v2334_v46 = vpack.c.bf16 %v452_v39, %v446_v37  ;;  %v506_v35 = vld [vmem:[#allocation5 + $0xe60] sm:$0xff]  ;;  %v2352_v36 = vpack.c.bf16 %v513_v29, %v507_v28  ;;  %v523_v39 = vld [vmem:[#allocation5 + $0xee8] sm:$0xff] }
 0x11a   :  { %v512_v37 = vld [vmem:[#allocation5 + $0xe90] sm:$0xff] }
 0x11b   :  { %2059 = vmatpush1.bf16.msra.mxu1 %v2058_v48  ;;  %v456_v48 = vld [vmem:[#allocation5 + $0xcd0] sm:$0xff]  ;;  %v2354_v43 = vpack.c.bf16 %v512_v37, %v506_v35  ;;  %v583_v35 = vld [vmem:[#allocation5 + $0x10c8] sm:$0xff]  ;;  %v585_v37 = vld [vmem:[#allocation5 + $0x10d8] sm:$0xff] }
 0x11c   :  { %2315 = vmatpush1.bf16.msra.mxu0 %v2314_v49  ;;  %2061 = vmatprep.subr.bf16.mxu1 %v2060_v50  ;;  %v462_v49 = vld [vmem:[#allocation5 + $0xd00] sm:$0xff]  ;;  %v564_v29 = vld [vmem:[#allocation5 + $0x1030] sm:$0xff] }
 0x11d   :  { %2317 = vmatprep.subr.bf16.mxu0 %v2316_v54  ;;  %v458_v50 = vld [vmem:[#allocation5 + $0xce0] sm:$0xff]  ;;  %v475_v54 = vld [vmem:[#allocation5 + $0xd68] sm:$0xff]  ;;  %v2082_v58 = vpack.c.bf16 %v462_v49, %v456_v48  ;;  %v2356_v48 = vpack.c.bf16 %v525_v41, %v519_v40  ;;  %v524_v49 = vld [vmem:[#allocation5 + $0xef0] sm:$0xff] }
 0x11e   :  { %v2338_v59 = vpack.c.bf16 %v464_v52, %v458_v50  ;;  %v529_v50 = vld [vmem:[#allocation5 + $0xf18] sm:$0xff]  ;;  %v531_v52 = vld [vmem:[#allocation5 + $0xf28] sm:$0xff]  ;;  %v576_v41 = vld [vmem:[#allocation5 + $0x1090] sm:$0xff] }
 0x11f   :  { %2063 = vmatpush1.bf16.msra.mxu1 %v2062_v60  ;;  %v2084_v60 = vpack.c.bf16 %v475_v54, %v469_v53  ;;  %v537_v53 = vld [vmem:[#allocation5 + $0xf58] sm:$0xff] }
 0x120   :  { %2319 = vmatpush1.bf16.msra.mxu0 %v2318_v61  ;;  %2065 = vmatprep.subr.bf16.mxu1 %v2064_v62  ;;  %v468_v61 = vld [vmem:[#allocation5 + $0xd30] sm:$0xff]  ;;  %v474_v62 = vld [vmem:[#allocation5 + $0xd60] sm:$0xff] }
 0x121   :  { %2321 = vmatprep.subr.bf16.mxu0 %v2320_v1  ;;  %v481_v1 = vld [vmem:[#allocation5 + $0xd98] sm:$0xff]  ;;  %v2086_v4 = vpack.c.bf16 %v474_v62, %v468_v61  ;;  %v536_v61 = vld [vmem:[#allocation5 + $0xf50] sm:$0xff] }
 0x122   :  { %v541_v62 = vld [vmem:[#allocation5 + $0xf78] sm:$0xff] }
 0x123   :  { %2067 = vmatpush1.bf16.msra.mxu1 %v2066_v6  ;;  %v2088_v6 = vpack.c.bf16 %v487_v2, %v481_v1  ;;  %v2108_v3 = vpack.c.bf16 %v547_v63, %v541_v62 }
 0x124   :  { %2323 = vmatpush1.bf16.msra.mxu0 %v2322_v7  ;;  %2069 = vmatprep.subr.bf16.mxu1 %v2068_v8  ;;  %v480_v7 = vld [vmem:[#allocation5 + $0xd90] sm:$0xff]  ;;  %v486_v8 = vld [vmem:[#allocation5 + $0xdc0] sm:$0xff] }
 0x125   :  { %2325 = vmatprep.subr.bf16.mxu0 %v2324_v12  ;;  %v493_v12 = vld [vmem:[#allocation5 + $0xdf8] sm:$0xff]  ;;  %v2090_v17 = vpack.c.bf16 %v486_v8, %v480_v7  ;;  %v548_v7 = vld [vmem:[#allocation5 + $0xfb0] sm:$0xff] }
 0x126   :  { %v553_v8 = vld [vmem:[#allocation5 + $0xfd8] sm:$0xff] }
 0x127   :  { %2071 = vmatpush1.bf16.msra.mxu1 %v2070_v19  ;;  %v2092_v19 = vpack.c.bf16 %v499_v13, %v493_v12  ;;  %v2112_v14 = vpack.c.bf16 %v559_v9, %v553_v8 }
 0x128   :  { %2327 = vmatpush1.bf16.msra.mxu0 %v2326_v20  ;;  %2073 = vmatprep.subr.bf16.mxu1 %v2072_v21  ;;  %v492_v20 = vld [vmem:[#allocation5 + $0xdf0] sm:$0xff]  ;;  %v498_v21 = vld [vmem:[#allocation5 + $0xe20] sm:$0xff] }
 0x129   :  { %2329 = vmatprep.subr.bf16.mxu0 %v2328_v25  ;;  %v505_v25 = vld [vmem:[#allocation5 + $0xe58] sm:$0xff]  ;;  %v2094_v30 = vpack.c.bf16 %v498_v21, %v492_v20  ;;  %v560_v20 = vld [vmem:[#allocation5 + $0x1010] sm:$0xff] }
 0x12a   :  { %1234 = vmatmul.mubr.f32.vlgmr.msra.gmra.mrb[2].mxu1 %v2480_v42  ;;  %v565_v21 = vld [vmem:[#allocation5 + $0x1038] sm:$0xff] }
 0x12b   :  { %2075 = vmatpush1.bf16.msra.mxu1 %v2074_v32  ;;  %1518 = vmatmul.mubr.f32.vlgmr.msra.gmra.mrb[2].mxu0 %v2480_v42  ;;  %v2096_v32 = vpack.c.bf16 %v511_v27, %v505_v25  ;;  %v2116_v28 = vpack.c.bf16 %v571_v22, %v565_v21 }
 0x12c   :  { %2331 = vmatpush1.bf16.msra.mxu0 %v2330_v33  ;;  %2077 = vmatprep.subr.bf16.mxu1 %v2076_v34  ;;  %v504_v33 = vld [vmem:[#allocation5 + $0xe50] sm:$0xff]  ;;  %v510_v34 = vld [vmem:[#allocation5 + $0xe80] sm:$0xff] }
 0x12d   :  { %2333 = vmatprep.subr.bf16.mxu0 %v2332_v38  ;;  %1304 = vmatprep.mubr.f32.mxu1 %v2481_v55  ;;  %v517_v38 = vld [vmem:[#allocation5 + $0xeb8] sm:$0xff]  ;;  %v2098_v42 = vpack.c.bf16 %v510_v34, %v504_v33  ;;  %v572_v33 = vld [vmem:[#allocation5 + $0x1070] sm:$0xff] }
 0x12e   :  { %1588 = vmatprep.mubr.f32.mxu0 %v2481_v55  ;;  %v2100_v44 = vpack.c.bf16 %v523_v39, %v517_v38  ;;  %v577_v34 = vld [vmem:[#allocation5 + $0x1098] sm:$0xff] }
 0x12f   :  { %2079 = vmatpush1.bf16.msra.mxu1 %v2078_v45  ;;  %v516_v45 = vld [vmem:[#allocation5 + $0xeb0] sm:$0xff]  ;;  %v2120_v40 = vpack.c.bf16 %v583_v35, %v577_v34 }
 0x130   :  { %2335 = vmatpush1.bf16.msra.mxu0 %v2334_v46  ;;  %2081 = vmatprep.subr.bf16.mxu1 %v2080_v47  ;;  %v522_v46 = vld [vmem:[#allocation5 + $0xee0] sm:$0xff] }
 0x131   :  { %2337 = vmatprep.subr.bf16.mxu0 %v2336_v51  ;;  %v518_v47 = vld [vmem:[#allocation5 + $0xec0] sm:$0xff]  ;;  %v535_v51 = vld [vmem:[#allocation5 + $0xf48] sm:$0xff]  ;;  %v2102_v54 = vpack.c.bf16 %v522_v46, %v516_v45  ;;  %v584_v45 = vld [vmem:[#allocation5 + $0x10d0] sm:$0xff] }
 0x132   :  { %v2358_v55 = vpack.c.bf16 %v524_v49, %v518_v47  ;;  %v2104_v56 = vpack.c.bf16 %v535_v51, %v529_v50  ;;  %v589_v46 = vld [vmem:[#allocation5 + $0x10f8] sm:$0xff]  ;;  %v595_v47 = vld [vmem:[#allocation5 + $0x1128] sm:$0xff] }
 0x133   :  { %2083 = vmatpush1.bf16.msra.mxu1 %v2082_v58  ;;  %v534_v58 = vld [vmem:[#allocation5 + $0xf40] sm:$0xff]  ;;  %v597_v49 = vld [vmem:[#allocation5 + $0x1138] sm:$0xff] }
 0x134   :  { %2339 = vmatpush1.bf16.msra.mxu0 %v2338_v59  ;;  %2085 = vmatprep.subr.bf16.mxu1 %v2084_v60  ;;  %v530_v59 = vld [vmem:[#allocation5 + $0xf20] sm:$0xff]  ;;  %v2360_v60 = vpack.c.bf16 %v537_v53, %v531_v52  ;;  %v2106_v1 = vpack.c.bf16 %v534_v58, %v528_v57  ;;  %v2124_v52 = vpack.c.bf16 %v595_v47, %v589_v46  ;;  %v588_v53 = vld [vmem:[#allocation5 + $0x10f0] sm:$0xff]  ;;  %v601_v58 = vld [vmem:[#allocation5 + $0x1158] sm:$0xff] }
 0x135   :  { %2341 = vmatprep.subr.bf16.mxu0 %v2340_v0  ;;  %v543_v0 = vld [vmem:[#allocation5 + $0xf88] sm:$0xff]  ;;  %v2362_v2 = vpack.c.bf16 %v536_v61, %v530_v59  ;;  %v596_v57 = vld [vmem:[#allocation5 + $0x1130] sm:$0xff]  ;;  %v609_v61 = vld [vmem:[#allocation5 + $0x1198] sm:$0xff] }
 0x136   :  { %v607_v59 = vld [vmem:[#allocation5 + $0x1188] sm:$0xff]  ;;  %v657_v46 = vld [vmem:[#allocation5 + $0x1318] sm:$0xff] }
 0x137   :  { %2087 = vmatpush1.bf16.msra.mxu1 %v2086_v4  ;;  %v546_v4 = vld [vmem:[#allocation5 + $0xfa0] sm:$0xff] }
 0x138   :  { %2343 = vmatpush1.bf16.msra.mxu0 %v2342_v5  ;;  %2089 = vmatprep.subr.bf16.mxu1 %v2088_v6  ;;  %v542_v5 = vld [vmem:[#allocation5 + $0xf80] sm:$0xff]  ;;  %v2364_v6 = vpack.c.bf16 %v549_v16, %v543_v0  ;;  %v2110_v12 = vpack.c.bf16 %v546_v4, %v540_v26  ;;  %v2128_v0 = vpack.c.bf16 %v607_v59, %v601_v58  ;;  %v600_v16 = vld [vmem:[#allocation5 + $0x1150] sm:$0xff]  ;;  %v613_v4 = vld [vmem:[#allocation5 + $0x11b8] sm:$0xff] }
 0x139   :  { %2345 = vmatprep.subr.bf16.mxu0 %v2344_v10  ;;  %v555_v10 = vld [vmem:[#allocation5 + $0xfe8] sm:$0xff]  ;;  %v2366_v13 = vpack.c.bf16 %v548_v7, %v542_v5  ;;  %v608_v26 = vld [vmem:[#allocation5 + $0x1190] sm:$0xff]  ;;  %v621_v7 = vld [vmem:[#allocation5 + $0x11f8] sm:$0xff] }
 0x13a   :  { %v619_v5 = vld [vmem:[#allocation5 + $0x11e8] sm:$0xff]  ;;  %v669_v59 = vld [vmem:[#allocation5 + $0x1378] sm:$0xff] }
 0x13b   :  { %2091 = vmatpush1.bf16.msra.mxu1 %v2090_v17  ;;  %v558_v17 = vld [vmem:[#allocation5 + $0x1000] sm:$0xff]  ;;  %v663_v58 = vld [vmem:[#allocation5 + $0x1348] sm:$0xff] }
 0x13c   :  { %2347 = vmatpush1.bf16.msra.mxu0 %v2346_v18  ;;  %2093 = vmatprep.subr.bf16.mxu1 %v2092_v19  ;;  %v554_v18 = vld [vmem:[#allocation5 + $0xfe0] sm:$0xff]  ;;  %v2368_v19 = vpack.c.bf16 %v561_v11, %v555_v10  ;;  %v2114_v25 = vpack.c.bf16 %v558_v17, %v552_v15  ;;  %v2132_v10 = vpack.c.bf16 %v619_v5, %v613_v4  ;;  %v612_v11 = vld [vmem:[#allocation5 + $0x11b0] sm:$0xff]  ;;  %v625_v17 = vld [vmem:[#allocation5 + $0x1218] sm:$0xff] }
 0x13d   :  { %2349 = vmatprep.subr.bf16.mxu0 %v2348_v23  ;;  %v567_v23 = vld [vmem:[#allocation5 + $0x1048] sm:$0xff]  ;;  %v2370_v27 = vpack.c.bf16 %v560_v20, %v554_v18  ;;  %v620_v15 = vld [vmem:[#allocation5 + $0x11f0] sm:$0xff]  ;;  %v633_v20 = vld [vmem:[#allocation5 + $0x1258] sm:$0xff] }
 0x13e   :  { %v631_v18 = vld [vmem:[#allocation5 + $0x1248] sm:$0xff]  ;;  %v681_v5 = vld [vmem:[#allocation5 + $0x13d8] sm:$0xff] }
 0x13f   :  { %2095 = vmatpush1.bf16.msra.mxu1 %v2094_v30  ;;  %v570_v30 = vld [vmem:[#allocation5 + $0x1060] sm:$0xff]  ;;  %v675_v4 = vld [vmem:[#allocation5 + $0x13a8] sm:$0xff] }
 0x140   :  { %2351 = vmatpush1.bf16.msra.mxu0 %v2350_v31  ;;  %2097 = vmatprep.subr.bf16.mxu1 %v2096_v32  ;;  %v566_v31 = vld [vmem:[#allocation5 + $0x1040] sm:$0xff]  ;;  %v2372_v32 = vpack.c.bf16 %v573_v24, %v567_v23  ;;  %v2118_v38 = vpack.c.bf16 %v570_v30, %v564_v29  ;;  %v2136_v23 = vpack.c.bf16 %v631_v18, %v625_v17  ;;  %v624_v24 = vld [vmem:[#allocation5 + $0x1210] sm:$0xff]  ;;  %v637_v30 = vld [vmem:[#allocation5 + $0x1278] sm:$0xff] }
 0x141   :  { %2353 = vmatprep.subr.bf16.mxu0 %v2352_v36  ;;  %v579_v36 = vld [vmem:[#allocation5 + $0x10a8] sm:$0xff]  ;;  %v2374_v39 = vpack.c.bf16 %v572_v33, %v566_v31  ;;  %v632_v29 = vld [vmem:[#allocation5 + $0x1250] sm:$0xff]  ;;  %v645_v33 = vld [vmem:[#allocation5 + $0x12b8] sm:$0xff] }
 0x142   :  { %v643_v31 = vld [vmem:[#allocation5 + $0x12a8] sm:$0xff]  ;;  %v693_v18 = vld [vmem:[#allocation5 + $0x1438] sm:$0xff] }
 0x143   :  { %2099 = vmatpush1.bf16.msra.mxu1 %v2098_v42  ;;  %v582_v42 = vld [vmem:[#allocation5 + $0x10c0] sm:$0xff]  ;;  %v687_v17 = vld [vmem:[#allocation5 + $0x1408] sm:$0xff] }
 0x144   :  { %2355 = vmatpush1.bf16.msra.mxu0 %v2354_v43  ;;  %2101 = vmatprep.subr.bf16.mxu1 %v2100_v44  ;;  %v578_v43 = vld [vmem:[#allocation5 + $0x10a0] sm:$0xff]  ;;  %v2376_v44 = vpack.c.bf16 %v585_v37, %v579_v36  ;;  %v2122_v50 = vpack.c.bf16 %v582_v42, %v576_v41  ;;  %v2140_v36 = vpack.c.bf16 %v643_v31, %v637_v30  ;;  %v636_v37 = vld [vmem:[#allocation5 + $0x1270] sm:$0xff]  ;;  %v649_v42 = vld [vmem:[#allocation5 + $0x12d8] sm:$0xff] }
 0x145   :  { %2357 = vmatprep.subr.bf16.mxu0 %v2356_v48  ;;  %v591_v48 = vld [vmem:[#allocation5 + $0x1108] sm:$0xff]  ;;  %v2378_v51 = vpack.c.bf16 %v584_v45, %v578_v43  ;;  %v644_v41 = vld [vmem:[#allocation5 + $0x12b0] sm:$0xff]  ;;  %v705_v31 = vld [vmem:[#allocation5 + $0x1498] sm:$0xff] }
 0x146   :  { %v655_v43 = vld [vmem:[#allocation5 + $0x1308] sm:$0xff] }
 0x147   :  { %2103 = vmatpush1.bf16.msra.mxu1 %v2102_v54  ;;  %v594_v54 = vld [vmem:[#allocation5 + $0x1120] sm:$0xff]  ;;  %v651_v45 = vld [vmem:[#allocation5 + $0x12e8] sm:$0xff] }
 0x148   :  { %2359 = vmatpush1.bf16.msra.mxu0 %v2358_v55  ;;  %2105 = vmatprep.subr.bf16.mxu1 %v2104_v56  ;;  %v590_v55 = vld [vmem:[#allocation5 + $0x1100] sm:$0xff]  ;;  %v2380_v56 = vpack.c.bf16 %v597_v49, %v591_v48  ;;  %v2126_v62 = vpack.c.bf16 %v594_v54, %v588_v53  ;;  %v2144_v49 = vpack.c.bf16 %v655_v43, %v649_v42  ;;  %v656_v54 = vld [vmem:[#allocation5 + $0x1310] sm:$0xff]  ;;  %v699_v30 = vld [vmem:[#allocation5 + $0x1468] sm:$0xff] }
 0x149   :  { %2361 = vmatprep.subr.bf16.mxu0 %v2360_v60  ;;  %v603_v60 = vld [vmem:[#allocation5 + $0x1168] sm:$0xff]  ;;  %v2382_v63 = vpack.c.bf16 %v596_v57, %v590_v55  ;;  %v2400_v53 = vpack.c.bf16 %v657_v46, %v651_v45  ;;  %v661_v55 = vld [vmem:[#allocation5 + $0x1338] sm:$0xff] }
 0x14a   :  { %v2483_v57 = vld [vmem:[#allocation2 + $0x38] sm:$0xff]  ;;  %v715_v42 = vld [vmem:[#allocation5 + $0x14e8] sm:$0xff] }
 0x14b   :  { %2107 = vmatpush1.bf16.msra.mxu1 %v2106_v1  ;;  %v606_v1 = vld [vmem:[#allocation5 + $0x1180] sm:$0xff]  ;;  %v711_v45 = vld [vmem:[#allocation5 + $0x14c8] sm:$0xff]  ;;  %v717_v46 = vld [vmem:[#allocation5 + $0x14f8] sm:$0xff] }
 0x14c   :  { %2363 = vmatpush1.bf16.msra.mxu0 %v2362_v2  ;;  %2109 = vmatprep.subr.bf16.mxu1 %v2108_v3  ;;  %v602_v2 = vld [vmem:[#allocation5 + $0x1160] sm:$0xff]  ;;  %v2384_v3 = vpack.c.bf16 %v609_v61, %v603_v60  ;;  %v2130_v8 = vpack.c.bf16 %v606_v1, %v600_v16  ;;  %v2404_v1 = vpack.c.bf16 %v669_v59, %v663_v58  ;;  %v721_v58 = vld [vmem:[#allocation5 + $0x1518] sm:$0xff]  ;;  %v727_v59 = vld [vmem:[#allocation5 + $0x1548] sm:$0xff] }
 0x14d   :  { %2365 = vmatprep.subr.bf16.mxu0 %v2364_v6  ;;  %v615_v6 = vld [vmem:[#allocation5 + $0x11c8] sm:$0xff]  ;;  %v2386_v9 = vpack.c.bf16 %v608_v26, %v602_v2  ;;  %v662_v16 = vld [vmem:[#allocation5 + $0x1340] sm:$0xff]  ;;  %v668_v2 = vld [vmem:[#allocation5 + $0x1370] sm:$0xff] }
 0x14e   :  { %v679_v26 = vld [vmem:[#allocation5 + $0x13c8] sm:$0xff] }
 0x14f   :  { %2111 = vmatpush1.bf16.msra.mxu1 %v2110_v12  ;;  %v618_v12 = vld [vmem:[#allocation5 + $0x11e0] sm:$0xff] }
 0x150   :  { %2367 = vmatpush1.bf16.msra.mxu0 %v2366_v13  ;;  %2113 = vmatprep.subr.bf16.mxu1 %v2112_v14  ;;  %v614_v13 = vld [vmem:[#allocation5 + $0x11c0] sm:$0xff]  ;;  %v2388_v14 = vpack.c.bf16 %v621_v7, %v615_v6  ;;  %v2134_v21 = vpack.c.bf16 %v618_v12, %v612_v11  ;;  %v2406_v7 = vpack.c.bf16 %v668_v2, %v662_v16  ;;  %v720_v16 = vld [vmem:[#allocation5 + $0x1510] sm:$0xff] }
 0x151   :  { %2369 = vmatprep.subr.bf16.mxu0 %v2368_v19  ;;  %v627_v19 = vld [vmem:[#allocation5 + $0x1228] sm:$0xff]  ;;  %v2390_v22 = vpack.c.bf16 %v620_v15, %v614_v13  ;;  %v674_v11 = vld [vmem:[#allocation5 + $0x13a0] sm:$0xff]  ;;  %v2408_v12 = vpack.c.bf16 %v681_v5, %v675_v4  ;;  %v680_v13 = vld [vmem:[#allocation5 + $0x13d0] sm:$0xff] }
 0x152   :  { %v691_v15 = vld [vmem:[#allocation5 + $0x1428] sm:$0xff]  ;;  %v722_v2 = vld [vmem:[#allocation5 + $0x1520] sm:$0xff]  ;;  %v733_v4 = vld [vmem:[#allocation5 + $0x1578] sm:$0xff] }
 0x153   :  { %2115 = vmatpush1.bf16.msra.mxu1 %v2114_v25  ;;  %v630_v25 = vld [vmem:[#allocation5 + $0x1240] sm:$0xff]  ;;  %v739_v5 = vld [vmem:[#allocation5 + $0x15a8] sm:$0xff] }
 0x154   :  { %2371 = vmatpush1.bf16.msra.mxu0 %v2370_v27  ;;  %2117 = vmatprep.subr.bf16.mxu1 %v2116_v28  ;;  %v626_v27 = vld [vmem:[#allocation5 + $0x1220] sm:$0xff]  ;;  %v2392_v28 = vpack.c.bf16 %v633_v20, %v627_v19  ;;  %v2138_v34 = vpack.c.bf16 %v630_v25, %v624_v24  ;;  %v2410_v20 = vpack.c.bf16 %v680_v13, %v674_v11  ;;  %v732_v11 = vld [vmem:[#allocation5 + $0x1570] sm:$0xff] }
 0x155   :  { %2373 = vmatprep.subr.bf16.mxu0 %v2372_v32  ;;  %v639_v32 = vld [vmem:[#allocation5 + $0x1288] sm:$0xff]  ;;  %v2394_v35 = vpack.c.bf16 %v632_v29, %v626_v27  ;;  %v686_v24 = vld [vmem:[#allocation5 + $0x1400] sm:$0xff]  ;;  %v2412_v25 = vpack.c.bf16 %v693_v18, %v687_v17  ;;  %v692_v27 = vld [vmem:[#allocation5 + $0x1430] sm:$0xff] }
 0x156   :  { %v703_v29 = vld [vmem:[#allocation5 + $0x1488] sm:$0xff]  ;;  %v734_v13 = vld [vmem:[#allocation5 + $0x1580] sm:$0xff]  ;;  %v745_v17 = vld [vmem:[#allocation5 + $0x15d8] sm:$0xff] }
 0x157   :  { %2119 = vmatpush1.bf16.msra.mxu1 %v2118_v38  ;;  %v642_v38 = vld [vmem:[#allocation5 + $0x12a0] sm:$0xff]  ;;  %v751_v18 = vld [vmem:[#allocation5 + $0x1608] sm:$0xff] }
 0x158   :  { %2375 = vmatpush1.bf16.msra.mxu0 %v2374_v39  ;;  %2121 = vmatprep.subr.bf16.mxu1 %v2120_v40  ;;  %v638_v39 = vld [vmem:[#allocation5 + $0x1280] sm:$0xff]  ;;  %v2396_v40 = vpack.c.bf16 %v645_v33, %v639_v32  ;;  %v2142_v47 = vpack.c.bf16 %v642_v38, %v636_v37  ;;  %v2414_v33 = vpack.c.bf16 %v692_v27, %v686_v24  ;;  %v744_v24 = vld [vmem:[#allocation5 + $0x15d0] sm:$0xff] }
 0x159   :  { %2377 = vmatprep.subr.bf16.mxu0 %v2376_v44  ;;  %v2482_v44 = vld [vmem:[#allocation2 + $0x20] sm:$0xff]  ;;  %v2398_v48 = vpack.c.bf16 %v644_v41, %v638_v39  ;;  %v2416_v39 = vpack.c.bf16 %v705_v31, %v699_v30  ;;  %v709_v41 = vld [vmem:[#allocation5 + $0x14b8] sm:$0xff]  ;;  %v763_v31 = vld [vmem:[#allocation5 + $0x1668] sm:$0xff] }
 0x15a   :  { %v698_v37 = vld [vmem:[#allocation5 + $0x1460] sm:$0xff]  ;;  %v757_v30 = vld [vmem:[#allocation5 + $0x1638] sm:$0xff] }
 0x15b   :  { %2123 = vmatpush1.bf16.msra.mxu1 %v2122_v50  ;;  %v648_v50 = vld [vmem:[#allocation5 + $0x12d0] sm:$0xff]  ;;  %v746_v27 = vld [vmem:[#allocation5 + $0x15e0] sm:$0xff] }
 0x15c   :  { %2379 = vmatpush1.bf16.msra.mxu0 %v2378_v51  ;;  %2125 = vmatprep.subr.bf16.mxu1 %v2124_v52  ;;  %v654_v51 = vld [vmem:[#allocation5 + $0x1300] sm:$0xff] }
 0x15d   :  { %2381 = vmatprep.subr.bf16.mxu0 %v2380_v56  ;;  %v650_v52 = vld [vmem:[#allocation5 + $0x12e0] sm:$0xff]  ;;  %v667_v56 = vld [vmem:[#allocation5 + $0x1368] sm:$0xff]  ;;  %v2146_v60 = vpack.c.bf16 %v654_v51, %v648_v50 }
 0x15e   :  { %v2402_v61 = vpack.c.bf16 %v656_v54, %v650_v52  ;;  %v2164_v52 = vpack.c.bf16 %v715_v42, %v709_v41  ;;  %v714_v54 = vld [vmem:[#allocation5 + $0x14e0] sm:$0xff]  ;;  %v764_v41 = vld [vmem:[#allocation5 + $0x1670] sm:$0xff]  ;;  %v769_v42 = vld [vmem:[#allocation5 + $0x1698] sm:$0xff] }
 0x15f   :  { %2127 = vmatpush1.bf16.msra.mxu1 %v2126_v62  ;;  %v2148_v62 = vpack.c.bf16 %v667_v56, %v661_v55  ;;  %v710_v55 = vld [vmem:[#allocation5 + $0x14c0] sm:$0xff]  ;;  %v2420_v56 = vpack.c.bf16 %v717_v46, %v711_v45  ;;  %v777_v45 = vld [vmem:[#allocation5 + $0x16d8] sm:$0xff] }
 0x160   :  { %2383 = vmatpush1.bf16.msra.mxu0 %v2382_v63  ;;  %2129 = vmatprep.subr.bf16.mxu1 %v2128_v0  ;;  %v660_v63 = vld [vmem:[#allocation5 + $0x1330] sm:$0xff]  ;;  %v666_v0 = vld [vmem:[#allocation5 + $0x1360] sm:$0xff] }
 0x161   :  { %2385 = vmatprep.subr.bf16.mxu0 %v2384_v3  ;;  %v673_v3 = vld [vmem:[#allocation5 + $0x1398] sm:$0xff]  ;;  %v2150_v6 = vpack.c.bf16 %v666_v0, %v660_v63  ;;  %v2168_v0 = vpack.c.bf16 %v727_v59, %v721_v58 }
 0x163   :  { %2131 = vmatpush1.bf16.msra.mxu1 %v2130_v8  ;;  %v2152_v8 = vpack.c.bf16 %v679_v26, %v673_v3  ;;  %v728_v26 = vld [vmem:[#allocation5 + $0x1550] sm:$0xff] }
 0x164   :  { %2387 = vmatpush1.bf16.msra.mxu0 %v2386_v9  ;;  %2133 = vmatprep.subr.bf16.mxu1 %v2132_v10  ;;  %v672_v9 = vld [vmem:[#allocation5 + $0x1390] sm:$0xff]  ;;  %v678_v10 = vld [vmem:[#allocation5 + $0x13c0] sm:$0xff] }
 0x165   :  { %2389 = vmatprep.subr.bf16.mxu0 %v2388_v14  ;;  %v685_v14 = vld [vmem:[#allocation5 + $0x13f8] sm:$0xff]  ;;  %v2154_v19 = vpack.c.bf16 %v678_v10, %v672_v9  ;;  %v2426_v9 = vpack.c.bf16 %v728_v26, %v722_v2  ;;  %v2172_v10 = vpack.c.bf16 %v739_v5, %v733_v4  ;;  %v799_v2 = vld [vmem:[#allocation5 + $0x1788] sm:$0xff] }
 0x166   :  { %v801_v26 = vld [vmem:[#allocation5 + $0x1798] sm:$0xff] }
 0x167   :  { %2135 = vmatpush1.bf16.msra.mxu1 %v2134_v21  ;;  %v2156_v21 = vpack.c.bf16 %v691_v15, %v685_v14  ;;  %v740_v15 = vld [vmem:[#allocation5 + $0x15b0] sm:$0xff] }
 0x168   :  { %2391 = vmatpush1.bf16.msra.mxu0 %v2390_v22  ;;  %2137 = vmatprep.subr.bf16.mxu1 %v2136_v23  ;;  %v684_v22 = vld [vmem:[#allocation5 + $0x13f0] sm:$0xff]  ;;  %v690_v23 = vld [vmem:[#allocation5 + $0x1420] sm:$0xff] }
 0x169   :  { %2393 = vmatprep.subr.bf16.mxu0 %v2392_v28  ;;  %v697_v28 = vld [vmem:[#allocation5 + $0x1458] sm:$0xff]  ;;  %v2158_v32 = vpack.c.bf16 %v690_v23, %v684_v22  ;;  %v2430_v22 = vpack.c.bf16 %v740_v15, %v734_v13  ;;  %v2176_v23 = vpack.c.bf16 %v751_v18, %v745_v17  ;;  %v811_v13 = vld [vmem:[#allocation5 + $0x17e8] sm:$0xff] }
 0x16a   :  { %1305 = vmatmul.mubr.f32.vlgmr.msra.gmra.mrb[2].mxu1 %v2482_v44  ;;  %v813_v15 = vld [vmem:[#allocation5 + $0x17f8] sm:$0xff] }
 0x16b   :  { %2139 = vmatpush1.bf16.msra.mxu1 %v2138_v34  ;;  %1589 = vmatmul.mubr.f32.vlgmr.msra.gmra.mrb[2].mxu0 %v2482_v44  ;;  %v2160_v34 = vpack.c.bf16 %v703_v29, %v697_v28  ;;  %v752_v29 = vld [vmem:[#allocation5 + $0x1610] sm:$0xff] }
 0x16c   :  { %2395 = vmatpush1.bf16.msra.mxu0 %v2394_v35  ;;  %2141 = vmatprep.subr.bf16.mxu1 %v2140_v36  ;;  %v696_v35 = vld [vmem:[#allocation5 + $0x1450] sm:$0xff]  ;;  %v702_v36 = vld [vmem:[#allocation5 + $0x1480] sm:$0xff] }
 0x16d   :  { %2397 = vmatprep.subr.bf16.mxu0 %v2396_v40  ;;  %1375 = vmatprep.mubr.f32.mxu1 %v2483_v57  ;;  %v704_v40 = vld [vmem:[#allocation5 + $0x1490] sm:$0xff] }
 0x16e   :  { %1659 = vmatprep.mubr.f32.mxu0 %v2483_v57  ;;  %v2418_v51 = vpack.c.bf16 %v704_v40, %v698_v37  ;;  %v716_v57 = vld [vmem:[#allocation5 + $0x14f0] sm:$0xff] }
 0x16f   :  { %2143 = vmatpush1.bf16.msra.mxu1 %v2142_v47  ;;  %v2422_v63 = vpack.c.bf16 %v716_v57, %v710_v55  ;;  %v756_v37 = vld [vmem:[#allocation5 + $0x1630] sm:$0xff]  ;;  %v787_v55 = vld [vmem:[#allocation5 + $0x1728] sm:$0xff]  ;;  %v789_v57 = vld [vmem:[#allocation5 + $0x1738] sm:$0xff] }
 0x170   :  { %2399 = vmatpush1.bf16.msra.mxu0 %v2398_v48  ;;  %2145 = vmatprep.subr.bf16.mxu1 %v2144_v49  ;;  %v2162_v49 = vpack.c.bf16 %v702_v36, %v696_v35  ;;  %v2434_v35 = vpack.c.bf16 %v752_v29, %v746_v27  ;;  %v2180_v36 = vpack.c.bf16 %v763_v31, %v757_v30 }
 0x171   :  { %2401 = vmatprep.subr.bf16.mxu0 %v2400_v53  ;;  %v708_v53 = vld [vmem:[#allocation5 + $0x14b0] sm:$0xff] }
 0x173   :  { %2147 = vmatpush1.bf16.msra.mxu1 %v2146_v60  ;;  %v723_v60 = vld [vmem:[#allocation5 + $0x1528] sm:$0xff] }
 0x174   :  { %2403 = vmatpush1.bf16.msra.mxu0 %v2402_v61  ;;  %2149 = vmatprep.subr.bf16.mxu1 %v2148_v62  ;;  %v729_v61 = vld [vmem:[#allocation5 + $0x1558] sm:$0xff]  ;;  %v2166_v62 = vpack.c.bf16 %v714_v54, %v708_v53  ;;  %v776_v53 = vld [vmem:[#allocation5 + $0x16d0] sm:$0xff] }
 0x175   :  { %2405 = vmatprep.subr.bf16.mxu0 %v2404_v1  ;;  %v726_v1 = vld [vmem:[#allocation5 + $0x1540] sm:$0xff]  ;;  %v2424_v3 = vpack.c.bf16 %v729_v61, %v723_v60  ;;  %v781_v54 = vld [vmem:[#allocation5 + $0x16f8] sm:$0xff]  ;;  %v780_v61 = vld [vmem:[#allocation5 + $0x16f0] sm:$0xff] }
 0x176   :  { %v2188_v60 = vpack.c.bf16 %v787_v55, %v781_v54 }
 0x177   :  { %2151 = vmatpush1.bf16.msra.mxu1 %v2150_v6  ;;  %v735_v6 = vld [vmem:[#allocation5 + $0x1588] sm:$0xff] }
 0x178   :  { %2407 = vmatpush1.bf16.msra.mxu0 %v2406_v7  ;;  %2153 = vmatprep.subr.bf16.mxu1 %v2152_v8  ;;  %v741_v7 = vld [vmem:[#allocation5 + $0x15b8] sm:$0xff]  ;;  %v2170_v8 = vpack.c.bf16 %v726_v1, %v720_v16  ;;  %v788_v16 = vld [vmem:[#allocation5 + $0x1730] sm:$0xff] }
 0x179   :  { %2409 = vmatprep.subr.bf16.mxu0 %v2408_v12  ;;  %v738_v12 = vld [vmem:[#allocation5 + $0x15a0] sm:$0xff]  ;;  %v2428_v14 = vpack.c.bf16 %v741_v7, %v735_v6  ;;  %v793_v1 = vld [vmem:[#allocation5 + $0x1758] sm:$0xff]  ;;  %v792_v7 = vld [vmem:[#allocation5 + $0x1750] sm:$0xff] }
 0x17a   :  { %v2192_v6 = vpack.c.bf16 %v799_v2, %v793_v1 }
 0x17b   :  { %2155 = vmatpush1.bf16.msra.mxu1 %v2154_v19  ;;  %v747_v19 = vld [vmem:[#allocation5 + $0x15e8] sm:$0xff] }
 0x17c   :  { %2411 = vmatpush1.bf16.msra.mxu0 %v2410_v20  ;;  %2157 = vmatprep.subr.bf16.mxu1 %v2156_v21  ;;  %v753_v20 = vld [vmem:[#allocation5 + $0x1618] sm:$0xff]  ;;  %v2174_v21 = vpack.c.bf16 %v738_v12, %v732_v11  ;;  %v800_v11 = vld [vmem:[#allocation5 + $0x1790] sm:$0xff] }
 0x17d   :  { %v951_v38 = vpop.f32.mrb[0].mxu1  ;;  %2413 = vmatprep.subr.bf16.mxu0 %v2412_v25  ;;  %v750_v25 = vld [vmem:[#allocation5 + $0x1600] sm:$0xff]  ;;  %v2432_v28 = vpack.c.bf16 %v753_v20, %v747_v19  ;;  %v805_v12 = vld [vmem:[#allocation5 + $0x17b8] sm:$0xff]  ;;  %v804_v20 = vld [vmem:[#allocation5 + $0x17b0] sm:$0xff] }
 0x17e   :  { %v1093_v43 = vpop.f32.mrb[0].mxu0  ;;  %v953_v44 = vpop.f32.mrb[1].mxu1  ;;  %v2196_v19 = vpack.c.bf16 %v811_v13, %v805_v12 }
 0x17f   :  { %v2456_v47 = vadd.f32 %v1093_v43, %v951_v38  ;;  %v1095_v48 = vpop.f32.mrb[1].mxu0  ;;  %2159 = vmatpush1.bf16.msra.mxu1 %v2158_v32  ;;  %v759_v32 = vld [vmem:[#allocation5 + $0x1648] sm:$0xff]  ;;  %v762_v38 = vld [vmem:[#allocation5 + $0x1660] sm:$0xff] }
 0x180   :  { %v2457_v50 = vadd.f32 %v1095_v48, %v953_v44  ;;  %2415 = vmatpush1.bf16.msra.mxu0 %v2414_v33  ;;  %2161 = vmatprep.subr.bf16.mxu1 %v2160_v34  ;;  %v765_v33 = vld [vmem:[#allocation5 + $0x1678] sm:$0xff]  ;;  %v2178_v34 = vpack.c.bf16 %v750_v25, %v744_v24  ;;  %v775_v43 = vld [vmem:[#allocation5 + $0x16c8] sm:$0xff]  ;;  %v2182_v46 = vpack.c.bf16 %v762_v38, %v756_v37  ;;  %v812_v24 = vld [vmem:[#allocation5 + $0x17f0] sm:$0xff] }
 0x181   :  { %1666 = vst [vmem:[#allocation7] sm:$0xff] %v2456_v47  ;;  %2417 = vmatprep.subr.bf16.mxu0 %v2416_v39  ;;  %v758_v39 = vld [vmem:[#allocation5 + $0x1640] sm:$0xff]  ;;  %v2436_v40 = vpack.c.bf16 %v765_v33, %v759_v32  ;;  %v771_v44 = vld [vmem:[#allocation5 + $0x16a8] sm:$0xff]  ;;  %v2184_v48 = vpack.c.bf16 %v775_v43, %v769_v42 }
 0x182   :  { %1667 = vst [vmem:[#allocation7 + $0x8] sm:$0xff] %v2457_v50  ;;  %v2438_v47 = vpack.c.bf16 %v764_v41, %v758_v39  ;;  %v774_v50 = vld [vmem:[#allocation5 + $0x16c0] sm:$0xff] }
 0x183   :  { %2163 = vmatpush1.bf16.msra.mxu1 %v2162_v49  ;;  %v768_v49 = vld [vmem:[#allocation5 + $0x1690] sm:$0xff] }
 0x184   :  { %2419 = vmatpush1.bf16.msra.mxu0 %v2418_v51  ;;  %2165 = vmatprep.subr.bf16.mxu1 %v2164_v52  ;;  %v770_v51 = vld [vmem:[#allocation5 + $0x16a0] sm:$0xff]  ;;  %v2440_v52 = vpack.c.bf16 %v777_v45, %v771_v44  ;;  %v2186_v58 = vpack.c.bf16 %v774_v50, %v768_v49 }
 0x185   :  { %2421 = vmatprep.subr.bf16.mxu0 %v2420_v56  ;;  %v783_v56 = vld [vmem:[#allocation5 + $0x1708] sm:$0xff]  ;;  %v2442_v59 = vpack.c.bf16 %v776_v53, %v770_v51 }
 0x187   :  { %2167 = vmatpush1.bf16.msra.mxu1 %v2166_v62  ;;  %v786_v62 = vld [vmem:[#allocation5 + $0x1720] sm:$0xff] }
 0x188   :  { %2423 = vmatpush1.bf16.msra.mxu0 %v2422_v63  ;;  %2169 = vmatprep.subr.bf16.mxu1 %v2168_v0  ;;  %v782_v63 = vld [vmem:[#allocation5 + $0x1700] sm:$0xff]  ;;  %v2444_v0 = vpack.c.bf16 %v789_v57, %v783_v56  ;;  %v2190_v4 = vpack.c.bf16 %v786_v62, %v780_v61 }
 0x189   :  { %2425 = vmatprep.subr.bf16.mxu0 %v2424_v3  ;;  %v795_v3 = vld [vmem:[#allocation5 + $0x1768] sm:$0xff]  ;;  %v2446_v5 = vpack.c.bf16 %v788_v16, %v782_v63 }
 0x18b   :  { %2171 = vmatpush1.bf16.msra.mxu1 %v2170_v8  ;;  %v798_v8 = vld [vmem:[#allocation5 + $0x1780] sm:$0xff] }
 0x18c   :  { %2427 = vmatpush1.bf16.msra.mxu0 %v2426_v9  ;;  %2173 = vmatprep.subr.bf16.mxu1 %v2172_v10  ;;  %v794_v9 = vld [vmem:[#allocation5 + $0x1760] sm:$0xff]  ;;  %v2448_v10 = vpack.c.bf16 %v801_v26, %v795_v3  ;;  %v2194_v17 = vpack.c.bf16 %v798_v8, %v792_v7 }
 0x18d   :  { %2429 = vmatprep.subr.bf16.mxu0 %v2428_v14  ;;  %v807_v14 = vld [vmem:[#allocation5 + $0x17c8] sm:$0xff]  ;;  %v2450_v18 = vpack.c.bf16 %v800_v11, %v794_v9 }
 0x18f   :  { %2175 = vmatpush1.bf16.msra.mxu1 %v2174_v21  ;;  %v810_v21 = vld [vmem:[#allocation5 + $0x17e0] sm:$0xff] }
 0x190   :  { %2431 = vmatpush1.bf16.msra.mxu0 %v2430_v22  ;;  %2177 = vmatprep.subr.bf16.mxu1 %v2176_v23  ;;  %v2452_v22 = vpack.c.bf16 %v813_v15, %v807_v14  ;;  %v806_v23 = vld [vmem:[#allocation5 + $0x17c0] sm:$0xff]  ;;  %v2198_v25 = vpack.c.bf16 %v810_v21, %v804_v20 }
 0x191   :  { %2433 = vmatprep.subr.bf16.mxu0 %v2432_v28  ;;  %v2454_v27 = vpack.c.bf16 %v812_v24, %v806_v23  ;;  %v2484_v28 = vld [vmem:[#allocation2 + $0x30] sm:$0xff] }
 0x193   :  { %2179 = vmatpush1.bf16.msra.mxu1 %v2178_v34 }
 0x194   :  { %2435 = vmatpush1.bf16.msra.mxu0 %v2434_v35  ;;  %2181 = vmatprep.subr.bf16.mxu1 %v2180_v36 }
 0x195   :  { %2437 = vmatprep.subr.bf16.mxu0 %v2436_v40 }
 0x197   :  { %2183 = vmatpush1.bf16.msra.mxu1 %v2182_v46 }
 0x198   :  { %2439 = vmatpush1.bf16.msra.mxu0 %v2438_v47  ;;  %2185 = vmatprep.subr.bf16.mxu1 %v2184_v48 }
 0x199   :  { %2441 = vmatprep.subr.bf16.mxu0 %v2440_v52 }
 0x19b   :  { %2187 = vmatpush1.bf16.msra.mxu1 %v2186_v58 }
 0x19c   :  { %2443 = vmatpush1.bf16.msra.mxu0 %v2442_v59  ;;  %2189 = vmatprep.subr.bf16.mxu1 %v2188_v60 }
 0x19d   :  { %2445 = vmatprep.subr.bf16.mxu0 %v2444_v0 }
 0x19f   :  { %2191 = vmatpush1.bf16.msra.mxu1 %v2190_v4 }
 0x1a0   :  { %2447 = vmatpush1.bf16.msra.mxu0 %v2446_v5  ;;  %2193 = vmatprep.subr.bf16.mxu1 %v2192_v6 }
 0x1a1   :  { %2449 = vmatprep.subr.bf16.mxu0 %v2448_v10 }
 0x1a3   :  { %2195 = vmatpush1.bf16.msra.mxu1 %v2194_v17 }
 0x1a4   :  { %2451 = vmatpush1.bf16.msra.mxu0 %v2450_v18  ;;  %2197 = vmatprep.subr.bf16.mxu1 %v2196_v19 }
 0x1a5   :  { %2453 = vmatprep.subr.bf16.mxu0 %v2452_v22 }
 0x1a7   :  { %2199 = vmatpush1.bf16.msra.mxu1 %v2198_v25 }
 0x1a8   :  { %2455 = vmatpush1.bf16.msra.mxu0 %v2454_v27 }
 0x1aa   :  { %1376 = vmatmul.mubr.f32.vlgmr.msra.gmra.mrb[2].mxu1 %v2484_v28 }
 0x1ab   :  { %1660 = vmatmul.mubr.f32.vlgmr.msra.gmra.mrb[2].mxu0 %v2484_v28 }
 0x27d   :  { %v1377_v29 = vpop.f32.mrb[2].mxu1 }
 0x27e   :  { %1668 = vst [vmem:[#allocation7 + $0x10] sm:$0xff] %v1377_v29  ;;  %v1661_v30 = vpop.f32.mrb[2].mxu0  ;;  %v1379_v31 = vpop.f32.mrb[3].mxu1 }
 0x27f   :  { %1670 = vst [vmem:[#allocation7 + $0x20] sm:$0xff] %v1661_v30  ;;  %1669 = vst [vmem:[#allocation7 + $0x18] sm:$0xff] %v1379_v31  ;;  %v1663_v32 = vpop.f32.mrb[3].mxu0 }
 0x280   :  { %1671 = vst [vmem:[#allocation7 + $0x28] sm:$0xff] %v1663_v32 }
 0x281   :  { %2540 = shalt.err (!%p2537_p6)
}
 0x282   :  { %s2541_s10 = scalar_lea.hbm %s2632_s2, 768 }
 0x283   :  { %p2542_p7 = scmp.ne.s32.totalorder %s2632_s2, %s2541_s10  ;;  %p2545_p8 = scmp.lt.u32.totalorder %s2541_s10, %s2632_s2 }
 0x285   :  { %p2547_p9 = pnand %p2545_p8, %p2542_p7 }
 0x287   :  { %2550 = shalt.err (!%p2547_p9)
}
 0x288   :  { %1681 = dma.vmem_to_hbm [thread:$0]  %s1679_s6, 768, %s2632_s2, [#allocation4]  }
 0x289   :  { %2555 = dma.done.wait [#allocation4], 768  }
 0x28a   :  { %2556 = vsyncadd [#allocation4], 4294966528 }
 0x28b   :  { %1685 = vsyncpa [#allocation3], 1 }
 0x28c   :  { %1686 = vsyncpa [#allocation6], 1 }
 0x28d   :  { %1687 = vsyncpa [#allocation4], 1 }

</bundles_post_ra>
